<compile_context>
chip_gen: v7x
topology: tpu7x:2x2x1
jax: 0.10.0
libtpu: 0.0.40
codegen_flags: <defaults>
</compile_context>

<pallas_src>
import functools

import jax
import jax.numpy as jnp
from jax.experimental import pallas as pl
from jax.experimental.pallas import tpu as pltpu

NEG_SLOPE = 0.01   # torch.nn.functional.leaky_relu default slope
ALPHA = 0.5        # Model.alpha residual weight
LANE = 128         # lane width; all feature dims are padded to this
TM = 256           # dst-row tile for the aggregation matmuls
TK_MAX = 512       # src (K) tile for the aggregation matmuls

NODE_TYPES = ("drug", "cell_line", "gene")
REL_DEFS = (
    # (relation name, src node type, dst node type); dense adj is (n_dst, n_src)
    ("drug_gene", "drug", "gene"),
    ("gene_drug", "gene", "drug"),
    ("cell_gene", "cell_line", "gene"),
    ("gene_cell", "gene", "cell_line"),
    ("gene_gene", "gene", "gene"),
)


# ----------------------------------------------------------------------------
# small helpers
# ----------------------------------------------------------------------------
def _ru(n, m):
    return ((int(n) + m - 1) // m) * m


def _pad_nodes(n):
    """Node counts -> multiple of 128; above TM also a multiple of TM."""
    p = _ru(max(n, 1), LANE)
    if p > TM:
        p = _ru(p, TM)
    return p


def _pad2d(x, rows, cols):
    return jnp.pad(x, ((0, rows - x.shape[0]), (0, cols - x.shape[1])))


def _pad_rows(x, rows):
    return jnp.pad(x, ((0, rows - x.shape[0]), (0, 0)))


def _leaky(x):
    return jnp.where(x >= 0, x, NEG_SLOPE * x)


def _mxu(a_bf16, b_bf16):
    """MXU matmul: bf16 operands, f32 accumulation."""
    return jnp.dot(a_bf16, b_bf16, preferred_element_type=jnp.float32)


# ----------------------------------------------------------------------------
# kernels
# ----------------------------------------------------------------------------
def _prep1_kernel(drug_raw_ref, cell_raw_ref, gene_ref,
                  denc_w_ref, denc_b_ref, cenc_w_ref, cenc_b_ref,
                  w_dsrc_ref, w_csrc_ref, w_gsrc_ref,
                  feat_drug_ref, feat_cell_ref,
                  y_gene_ref, y_drug_ref, y_cell_ref,
                  *, n_drug_p, n_cell_p, n_gene_p):
    """Layer-1 prep: input encoders (Linear + leaky_relu) and the small
    per-relation X_src @ W_r matmuls (Y-first ordering).  The three
    gene-source relations share one K=128, N=384 matmul."""
    bf = jnp.bfloat16
    d_feat = _leaky(_mxu(drug_raw_ref[...].astype(bf), denc_w_ref[...]) + denc_b_ref[...])
    c_feat = _leaky(_mxu(cell_raw_ref[...].astype(bf), cenc_w_ref[...]) + cenc_b_ref[...])
    feat_drug_ref[...] = d_feat
    feat_cell_ref[...] = c_feat

    # bf16 casts hoisted: exactly once per source node type.
    d_bf, c_bf, g_bf = d_feat.astype(bf), c_feat.astype(bf), gene_ref[...].astype(bf)

    # Messages into 'gene', concatenated along K for the tiled aggregation.
    y_gene_ref[pl.ds(0, n_drug_p), :] = _mxu(d_bf, w_dsrc_ref[...]).astype(bf)
    y_gene_ref[pl.ds(n_drug_p, n_cell_p), :] = _mxu(c_bf, w_csrc_ref[...]).astype(bf)

    # Gene-source relations: one wide matmul, lane-sliced into the 3 outputs.
    g_out = _mxu(g_bf, w_gsrc_ref[...])                      # (n_gene_p, 3*LANE)
    y_drug_ref[...] = g_out[:, 0:LANE].astype(bf)
    y_cell_ref[...] = g_out[:, LANE:2 * LANE].astype(bf)
    y_gene_ref[pl.ds(n_drug_p + n_cell_p, n_gene_p), :] = (
        g_out[:, 2 * LANE:3 * LANE].astype(bf))


def _xw_kernel(x_ref, w_ref, y_ref):
    """Y = X @ W (bf16 MXU, f32 acc): per-relation message pre-projection."""
    y_ref[...] = _mxu(x_ref[...].astype(jnp.bfloat16), w_ref[...]).astype(y_ref.dtype)


def _agg_kernel(a_ref, y_ref, res_ref, bias_ref, o_ref, acc_ref):
    """Tiled  out = leaky_relu(A_norm @ Y + bias_sum + alpha * residual).

    grid = (dst_tiles "parallel", src_tiles "arbitrary"); acc is a f32 VMEM
    scratch accumulator, initialized at k==0 and finalized at the last k."""
    k = pl.program_id(1)

    @pl.when(k == 0)
    def _():
        acc_ref[...] = jnp.zeros_like(acc_ref)

    acc_ref[...] += jnp.dot(a_ref[...], y_ref[...],
                            preferred_element_type=jnp.float32)

    @pl.when(k == pl.num_programs(1) - 1)
    def _():
        o_ref[...] = _leaky(acc_ref[...] + bias_ref[...]
                            + ALPHA * res_ref[...]).astype(o_ref.dtype)


def _head_kernel(cell_ref, drug_ref, ew_ref, eb_ref,
                 mwe_ref, mwd_ref, mb_ref, ow_ref, ob_ref, o_ref):
    """expr_enc + (concat->mid as split-weight matmuls) + out, fully fused.
    out_w is zero-padded to 128 columns so the final store is lane-dense."""
    bf = jnp.bfloat16
    e = _leaky(_mxu(cell_ref[...].astype(bf), ew_ref[...]) + eb_ref[...])
    m = _leaky(_mxu(e.astype(bf), mwe_ref[...])
               + _mxu(drug_ref[...].astype(bf), mwd_ref[...]) + mb_ref[...])
    o_ref[...] = (_mxu(m.astype(bf), ow_ref[...]) + ob_ref[...]).astype(o_ref.dtype)


# ----------------------------------------------------------------------------
# pallas_call wrappers
# ----------------------------------------------------------------------------
def _aggregate(a_norm, y, res, bias):
    """Tiled aggregation pallas_call for one destination node type."""
    n_dst, K = a_norm.shape
    tm = n_dst if n_dst <= TM else TM
    if K <= TK_MAX:
        tk = K
    else:
        tk = next(t for t in (512, 256, 128) if K % t == 0)
    grid = (n_dst // tm, K // tk)

    flops = 2 * n_dst * K * LANE
    bytes_accessed = (a_norm.size * 2 + y.size * 2 + res.size * 4
                      + bias.size * 4 + n_dst * LANE * 4)

    return pl.pallas_call(
        _agg_kernel,
        out_shape=jax.ShapeDtypeStruct((n_dst, LANE), jnp.float32),
        grid_spec=pltpu.PrefetchScalarGridSpec(
            num_scalar_prefetch=0,
            grid=grid,
            in_specs=[
                pl.BlockSpec((tm, tk), lambda i, k: (i, k)),      # A_norm (bf16)
                pl.BlockSpec((tk, LANE), lambda i, k: (k, 0)),    # Y      (bf16)
                pl.BlockSpec((tm, LANE), lambda i, k: (i, 0)),    # residual (f32)
                pl.BlockSpec((1, LANE), lambda i, k: (0, 0)),     # summed bias
            ],
            out_specs=pl.BlockSpec((tm, LANE), lambda i, k: (i, 0)),
            scratch_shapes=[pltpu.VMEM((tm, LANE), jnp.float32)],
        ),
        compiler_params=pltpu.CompilerParams(
            dimension_semantics=("parallel", "arbitrary")),
        cost_estimate=pl.CostEstimate(flops=flops, transcendentals=0,
                                      bytes_accessed=bytes_accessed),
    )(a_norm, y, res, bias)


def model_forward(params, graph, drug_features, cell_features,
                  cell_index, drug_index, gene_index, *, dims):
    ndp, ncp, ngp = dims["n_drug_p"], dims["n_cell_p"], dims["n_gene_p"]
    k_gene = ndp + ncp + ngp

    # ---- XLA glue: embedding lookup, gathers, zero padding ----
    gene_feat = _pad_rows(params["gene_emb"][gene_index], ngp)        # (ngp, 128)
    drug_raw = _pad2d(drug_features, ndp, dims["f_drug_p"])
    cell_raw = _pad2d(cell_features, ncp, dims["f_cell_p"])

    # ---- layer 1: encoders + per-relation projections, then tiled agg ----
    enc, c1 = params["enc"], params["conv1"]
    prep1 = functools.partial(_prep1_kernel, n_drug_p=ndp, n_cell_p=ncp,
                              n_gene_p=ngp)
    feat_drug, feat_cell, y_gene, y_drug, y_cell = pl.pallas_call(
        prep1,
        out_shape=(
            jax.ShapeDtypeStruct((ndp, LANE), jnp.float32),
            jax.ShapeDtypeStruct((ncp, LANE), jnp.float32),
            jax.ShapeDtypeStruct((k_gene, LANE), jnp.bfloat16),
            jax.ShapeDtypeStruct((ngp, LANE), jnp.bfloat16),
            jax.ShapeDtypeStruct((ngp, LANE), jnp.bfloat16),
        ),
    )(drug_raw, cell_raw, gene_feat,
      enc["drug_w"], enc["drug_b"], enc["cell_w"], enc["cell_b"],
      c1["w_drug_src"], c1["w_cell_src"], c1["w_gene_src"])

    h1_gene = _aggregate(graph["a_gene"], y_gene, gene_feat, c1["b_gene"])
    h1_drug = _aggregate(graph["a_drug"], y_drug, feat_drug, c1["b_drug"])
    # h1 cell_line is not consumed by forward(); XLA dead-code-eliminates it.
    h1_cell = _aggregate(graph["a_cell"], y_cell, feat_cell, c1["b_cell"])  # noqa: F841

    # ---- layer 2: forward() only consumes h2['drug'] (gene / cell_line are
    # discarded by the PyTorch forward), so only the drug destination runs ----
    c2 = params["conv2"]
    y_drug2 = pl.pallas_call(
        _xw_kernel,
        out_shape=jax.ShapeDtypeStruct((ngp, LANE), jnp.bfloat16),
    )(h1_gene, c2["w_gene_drug"])
    h2_drug = _aggregate(graph["a_drug"], y_drug2, h1_drug, c2["b_drug"])

    # ---- prediction head (in_drop / mid_drop are identity at inference) ----
    batch = cell_index.shape[0]
    b_p = _ru(max(batch, 1), 16)
    cell_sel = _pad2d(cell_features[cell_index], b_p, dims["f_cell_p"])
    drug_sel = _pad_rows(h2_drug[drug_index], b_p)
    hp = params["head"]
    out_p = pl.pallas_call(
        _head_kernel,
        out_shape=jax.ShapeDtypeStruct((b_p, LANE), jnp.float32),
    )(cell_sel, drug_sel, hp["expr_w"], hp["expr_b"],
      hp["mid_w_e"], hp["mid_w_d"], hp["mid_b"], hp["out_w"], hp["out_b"])
    return out_p[:batch, :1]


# ----------------------------------------------------------------------------
# parameter / graph preparation (offline)
# ----------------------------------------------------------------------------
def make_dims(hyp, n_drugs, n_cells, n_genes):
    cdp = _ru(hyp["common_dim"], LANE)
    assert cdp == LANE, "TODO(synk): tile the feature dim for common_dim > 128"
    return dict(
        cdp=cdp,
        eep=_ru(hyp["expr_enc"], LANE),
        midp=_ru(hyp["mid"], LANE),
        f_drug_p=_ru(hyp["n_drug_feats"], LANE),
        f_cell_p=_ru(hyp["n_cl_feats"], LANE),
        n_drug_p=_pad_nodes(n_drugs),
        n_cell_p=_pad_nodes(n_cells),
        n_gene_p=_pad_nodes(n_genes),
    )


def make_params(key, hyp, n_gene_nodes, rel_names):
    """Raw parameters in (fan_in, fan_out) layout (PyTorch-equivalent)."""
    ks = iter(jax.random.split(key, 64))
    cd = hyp["common_dim"]

    def lin(k, fan_in, fan_out):
        k1, k2 = jax.random.split(k)
        w = 0.1 * jax.random.normal(k1, (fan_in, fan_out), jnp.float32)
        b = 0.1 * jax.random.normal(k2, (fan_out,), jnp.float32)
        return w, b

    params = {}
    params["gene_emb"] = 0.1 * jax.random.normal(next(ks), (n_gene_nodes, cd),
                                                 jnp.float32)
    params["drug_enc_w"], params["drug_enc_b"] = lin(next(ks), hyp["n_drug_feats"], cd)
    params["cell_enc_w"], params["cell_enc_b"] = lin(next(ks), hyp["n_cl_feats"], cd)
    params["expr_enc_w"], params["expr_enc_b"] = lin(next(ks), hyp["n_cl_feats"],
                                                     hyp["expr_enc"])
    params["mid_w"], params["mid_b"] = lin(next(ks), hyp["expr_enc"] + cd, hyp["mid"])
    params["out_w"], params["out_b"] = lin(next(ks), hyp["mid"], 1)
    params["conv1"] = {rel: lin(next(ks), cd, cd) for rel in rel_names}
    params["conv2"] = {rel: lin(next(ks), cd, cd) for rel in rel_names}
    return params


def prepare_params(raw, hyp, dims):
    """Zero-pad to lane-dense shapes, cast weights bf16, pre-sum per-dst
    relation biases, fuse the gene-source conv weights along N (K-widening).

    Zero padding is exact: padded rows/cols stay identically zero through
    every matmul / bias / leaky_relu / residual in the logical region."""
    bf = jnp.bfloat16
    cdp, eep, midp = dims["cdp"], dims["eep"], dims["midp"]

    def wpad(w, r, c, dt=bf):
        return _pad2d(w, r, c).astype(dt)

    def bpad(b, c):
        return _pad2d(b.reshape(1, -1), 1, c)                 # stays f32

    p = {}
    p["gene_emb"] = _pad2d(raw["gene_emb"], raw["gene_emb"].shape[0], cdp)  # f32
    p["enc"] = {
        "drug_w": wpad(raw["drug_enc_w"], dims["f_drug_p"], cdp),
        "drug_b": bpad(raw["drug_enc_b"], cdp),
        "cell_w": wpad(raw["cell_enc_w"], dims["f_cell_p"], cdp),
        "cell_b": bpad(raw["cell_enc_b"], cdp),
    }
    for layer in ("conv1", "conv2"):
        w = {rel: _pad2d(wb[0], cdp, cdp) for rel, wb in raw[layer].items()}
        b = {rel: wb[1] for rel, wb in raw[layer].items()}
        p[layer] = {
            "w_drug_src": w["drug_gene"].astype(bf),
            "w_cell_src": w["cell_gene"].astype(bf),
            "w_gene_src": jnp.concatenate(
                [w["gene_drug"], w["gene_cell"], w["gene_gene"]], axis=1).astype(bf),
            "w_gene_drug": w["gene_drug"].astype(bf),
            "b_gene": bpad(b["drug_gene"] + b["cell_gene"] + b["gene_gene"], cdp),
            "b_drug": bpad(b["gene_drug"], cdp),
            "b_cell": bpad(b["gene_cell"], cdp),
        }
    ee = hyp["expr_enc"]
    p["head"] = {
        "expr_w": wpad(raw["expr_enc_w"], dims["f_cell_p"], eep),
        "expr_b": bpad(raw["expr_enc_b"], eep),
        "mid_w_e": wpad(raw["mid_w"][:ee], eep, midp),
        "mid_w_d": wpad(raw["mid_w"][ee:], cdp, midp),
        "mid_b": bpad(raw["mid_b"], midp),
        "out_w": wpad(raw["out_w"], midp, LANE),   # lane-dense; only col 0 real
        "out_b": bpad(raw["out_b"].reshape(1, 1), LANE),
    }
    return p


def prepare_graph(adjs, dims):
    """Pre-normalize (DGL GraphConv norm='both', degrees clamped to >=1),
    zero-pad node counts, concatenate gene-destination relations along K,
    and store the normalized adjacencies in bf16."""
    bf = jnp.bfloat16

    def norm(a):
        out_deg = jnp.maximum(jnp.sum(a, axis=0, keepdims=True), 1.0)  # src out-deg
        in_deg = jnp.maximum(jnp.sum(a, axis=1, keepdims=True), 1.0)   # dst in-deg
        return a * jax.lax.rsqrt(out_deg) * jax.lax.rsqrt(in_deg)

    ndp, ncp, ngp = dims["n_drug_p"], dims["n_cell_p"], dims["n_gene_p"]
    a_dg = _pad2d(norm(adjs["drug_gene"]), ngp, ndp)   # (gene, drug)
    a_cg = _pad2d(norm(adjs["cell_gene"]), ngp, ncp)   # (gene, cell)
    a_gg = _pad2d(norm(adjs["gene_gene"]), ngp, ngp)   # (gene, gene)
    a_gd = _pad2d(norm(adjs["gene_drug"]), ndp, ngp)   # (drug, gene)
    a_gc = _pad2d(norm(adjs["gene_cell"]), ncp, ngp)   # (cell, gene)
    return {
        "a_gene": jnp.concatenate([a_dg, a_cg, a_gg], axis=1).astype(bf),
        "a_drug": a_gd.astype(bf),
        "a_cell": a_gc.astype(bf),
    }


def make_graph(key, n_drugs, n_cells, n_genes):
    """Dense per-relation adjacencies, shape (n_dst, n_src)."""
    counts = {"drug": n_drugs, "cell_line": n_cells, "gene": n_genes}
    adjs = {}
    for i, (rel, src, dst) in enumerate(REL_DEFS):
        k = jax.random.fold_in(key, i)
        adjs[rel] = jax.random.bernoulli(
            k, 0.3, (counts[dst], counts[src])).astype(jnp.float32)
    return adjs


# ----------------------------------------------------------------------------
if __name__ == "__main__":
    hyp = {
        "common_dim": 32,
        "n_drug_feats": 16,
        "n_cl_feats": 24,
        "expr_enc": 16,
        "mid": 32,
        "drop": [0.0, 0.0],   # dropout is identity at inference anyway
    }
    n_gene_nodes = 20    # embedding table size
    n_genes_graph = 16   # gene nodes actually in the graph (via gene_index)
    n_drugs, n_cells = 6, 5
    batch = 4

    root = jax.random.PRNGKey(0)
    k_par, k_graph, k_drug, k_cell = jax.random.split(root, 4)

    rel_names = [r for r, _, _ in REL_DEFS]
    raw_params = make_params(k_par, hyp, n_gene_nodes, rel_names)
    dims = make_dims(hyp, n_drugs, n_cells, n_genes_graph)
    params = prepare_params(raw_params, hyp, dims)
    graph = prepare_graph(make_graph(k_graph, n_drugs, n_cells, n_genes_graph), dims)

    drug_features = jax.random.normal(k_drug, (n_drugs, hyp["n_drug_feats"]),
                                      jnp.float32)
    cell_features = jax.random.normal(k_cell, (n_cells, hyp["n_cl_feats"]),
                                      jnp.float32)
    gene_index = jnp.arange(n_genes_graph, dtype=jnp.int32)
    cell_index = jnp.array([0, 1, 2, 3], dtype=jnp.int32)
    drug_index = jnp.array([1, 3, 5, 0], dtype=jnp.int32)

    fwd = jax.jit(functools.partial(model_forward, dims=dims))
    out = fwd(params, graph, drug_features, cell_features,
              cell_index, drug_index, gene_index)
    out = jax.block_until_ready(out)
    assert out.shape == (batch, 1), out.shape
    print("KERNEL_OK")
</pallas_src>

<mosaic_0001>
module attributes {stable_mosaic.version = 11 : i64} {
  func.func @_xw_kernel(%arg0: memref<128x128xf32, #tpu.memory_space<vmem>>, %arg1: memref<128x128xbf16, #tpu.memory_space<vmem>>, %arg2: memref<128x128xbf16, #tpu.memory_space<vmem>>) attributes {dimension_semantics = [], scalar_prefetch = 0 : i64, scratch_operands = 0 : i64, tpu.core_type = #tpu.core_type<tc>} {
    %c0 = arith.constant 0 : index
    %c0_0 = arith.constant 0 : index
    %0 = vector.load %arg0[%c0, %c0_0] : memref<128x128xf32, #tpu.memory_space<vmem>>, vector<128x128xf32>
    %1 = arith.truncf %0 : vector<128x128xf32> to vector<128x128xbf16>
    %c0_1 = arith.constant 0 : index
    %c0_2 = arith.constant 0 : index
    %2 = vector.load %arg1[%c0_1, %c0_2] : memref<128x128xbf16, #tpu.memory_space<vmem>>, vector<128x128xbf16>
    %cst = arith.constant dense<0.000000e+00> : vector<128x128xf32>
    %3 = tpu.matmul %1, %2, %cst {dimension_numbers = #tpu.dot_dimension_numbers<[1], [0], [0], [1], [0, 0, 1, 1], [], []>} : vector<128x128xbf16>, vector<128x128xbf16>, vector<128x128xf32> -> vector<128x128xf32>
    %4 = arith.truncf %3 : vector<128x128xf32> to vector<128x128xbf16>
    %c0_3 = arith.constant 0 : index
    %c0_4 = arith.constant 0 : index
    %5 = vector.load %arg2[%c0_3, %c0_4] : memref<128x128xbf16, #tpu.memory_space<vmem>>, vector<128x128xbf16>
    tpu.vector_store %arg2[%c0_3, %c0_4], %4 {strides = array<i32>} : memref<128x128xbf16, #tpu.memory_space<vmem>>, vector<128x128xbf16>,
    return
  }
}

module attributes {stable_mosaic.version = 11 : i64} {
  func.func @_agg_kernel(%arg0: i32, %arg1: i32, %arg2: memref<128x128xbf16, #tpu.memory_space<vmem>>, %arg3: memref<128x128xbf16, #tpu.memory_space<vmem>>, %arg4: memref<128x128xf32, #tpu.memory_space<vmem>>, %arg5: memref<1x128xf32, #tpu.memory_space<vmem>>, %arg6: memref<128x128xf32, #tpu.memory_space<vmem>>, %arg7: memref<128x128xf32, #tpu.memory_space<vmem>>) attributes {dimension_semantics = [#tpu.dimension_semantics<parallel>, #tpu.dimension_semantics<arbitrary>], iteration_bounds = array<i64: 1, 1>, scalar_prefetch = 0 : i64, scratch_operands = 1 : i64, tpu.core_type = #tpu.core_type<tc>, window_params = [{transform_indices = @transform_0, window_bounds = array<i64: 128, 128>}, {transform_indices = @transform_1, window_bounds = array<i64: 128, 128>}, {transform_indices = @transform_2, window_bounds = array<i64: 128, 128>}, {pipeline_mode = #tpu.pipeline_mode<synchronous>, transform_indices = @transform_3, window_bounds = array<i64: 1, 128>}, {transform_indices = @transform_4, window_bounds = array<i64: 128, 128>}]} {
    %c0_i32 = arith.constant 0 : i32
    %0 = arith.cmpi eq, %arg1, %c0_i32 : i32
    %1 = arith.extui %0 : i1 to i32
    %c0_i32_0 = arith.constant 0 : i32
    %2 = arith.cmpi ne, %1, %c0_i32_0 : i32
    scf.if %2 {
      %cst_10 = arith.constant 0.000000e+00 : f32
      %12 = vector.broadcast %cst_10 : f32 to vector<128x128xf32>
      %c0_11 = arith.constant 0 : index
      %c0_12 = arith.constant 0 : index
      %13 = vector.load %arg7[%c0_11, %c0_12] : memref<128x128xf32, #tpu.memory_space<vmem>>, vector<128x128xf32>
      tpu.vector_store %arg7[%c0_11, %c0_12], %12 {strides = array<i32>} : memref<128x128xf32, #tpu.memory_space<vmem>>, vector<128x128xf32>,
    } else {
    }
    %c0 = arith.constant 0 : index
    %c0_1 = arith.constant 0 : index
    %3 = vector.load %arg7[%c0, %c0_1] : memref<128x128xf32, #tpu.memory_space<vmem>>, vector<128x128xf32>
    %c0_2 = arith.constant 0 : index
    %c0_3 = arith.constant 0 : index
    %4 = vector.load %arg2[%c0_2, %c0_3] : memref<128x128xbf16, #tpu.memory_space<vmem>>, vector<128x128xbf16>
    %c0_4 = arith.constant 0 : index
    %c0_5 = arith.constant 0 : index
    %5 = vector.load %arg3[%c0_4, %c0_5] : memref<128x128xbf16, #tpu.memory_space<vmem>>, vector<128x128xbf16>
    %cst = arith.constant dense<0.000000e+00> : vector<128x128xf32>
    %6 = tpu.matmul %4, %5, %cst {dimension_numbers = #tpu.dot_dimension_numbers<[1], [0], [0], [1], [0, 0, 1, 1], [], []>} : vector<128x128xbf16>, vector<128x128xbf16>, vector<128x128xf32> -> vector<128x128xf32>
    %7 = arith.addf %3, %6 : vector<128x128xf32>
    %c0_6 = arith.constant 0 : index
    %c0_7 = arith.constant 0 : index
    %8 = vector.load %arg7[%c0_6, %c0_7] : memref<128x128xf32, #tpu.memory_space<vmem>>, vector<128x128xf32>
    tpu.vector_store %arg7[%c0_6, %c0_7], %7 {strides = array<i32>} : memref<128x128xf32, #tpu.memory_space<vmem>>, vector<128x128xf32>,
    %c0_i32_8 = arith.constant 0 : i32
    %9 = arith.cmpi eq, %arg1, %c0_i32_8 : i32
    %10 = arith.extui %9 : i1 to i32
    %c0_i32_9 = arith.constant 0 : i32
    %11 = arith.cmpi ne, %10, %c0_i32_9 : i32
    scf.if %11 {
      %c0_10 = arith.constant 0 : index
      %c0_11 = arith.constant 0 : index
      %12 = vector.load %arg7[%c0_10, %c0_11] : memref<128x128xf32, #tpu.memory_space<vmem>>, vector<128x128xf32>
      %c0_12 = arith.constant 0 : index
      %c0_13 = arith.constant 0 : index
      %13 = vector.load %arg5[%c0_12, %c0_13] : memref<1x128xf32, #tpu.memory_space<vmem>>, vector<1x128xf32>
      %14 = vector.broadcast %13 : vector<1x128xf32> to vector<128x128xf32>
      %15 = arith.addf %12, %14 : vector<128x128xf32>
      %c0_14 = arith.constant 0 : index
      %c0_15 = arith.constant 0 : index
      %16 = vector.load %arg4[%c0_14, %c0_15] : memref<128x128xf32, #tpu.memory_space<vmem>>, vector<128x128xf32>
      %cst_16 = arith.constant 5.000000e-01 : f32
      %17 = vector.broadcast %cst_16 : f32 to vector<128x128xf32>
      %18 = arith.mulf %17, %16 : vector<128x128xf32>
      %19 = arith.addf %15, %18 : vector<128x128xf32>
      %cst_17 = arith.constant 0.000000e+00 : f32
      %20 = vector.broadcast %cst_17 : f32 to vector<128x128xf32>
      %21 = arith.cmpf oge, %19, %20 : vector<128x128xf32>
      %cst_18 = arith.constant 0.00999999977 : f32
      %22 = vector.broadcast %cst_18 : f32 to vector<128x128xf32>
      %23 = arith.mulf %22, %19 : vector<128x128xf32>
      %24 = arith.select %21, %19, %23 : vector<128x128xi1>, vector<128x128xf32>
      %c0_19 = arith.constant 0 : index
      %c0_20 = arith.constant 0 : index
      %25 = vector.load %arg6[%c0_19, %c0_20] : memref<128x128xf32, #tpu.memory_space<vmem>>, vector<128x128xf32>
      tpu.vector_store %arg6[%c0_19, %c0_20], %24 {strides = array<i32>} : memref<128x128xf32, #tpu.memory_space<vmem>>, vector<128x128xf32>,
    } else {
    }
    return
  }
  func.func @transform_0(%arg0: i32, %arg1: i32) -> (i32, i32) {
    %c0_i32 = arith.constant 0 : i32
    return %arg0, %arg1 : i32, i32
  }
  func.func @transform_1(%arg0: i32, %arg1: i32) -> (i32, i32) {
    %c0_i32 = arith.constant 0 : i32
    %c0_i32_0 = arith.constant 0 : i32
    return %arg1, %c0_i32 : i32, i32
  }
  func.func @transform_2(%arg0: i32, %arg1: i32) -> (i32, i32) {
    %c0_i32 = arith.constant 0 : i32
    %c0_i32_0 = arith.constant 0 : i32
    return %arg0, %c0_i32 : i32, i32
  }
  func.func @transform_3(%arg0: i32, %arg1: i32) -> (i32, i32) {
    %c0_i32 = arith.constant 0 : i32
    %c0_i32_0 = arith.constant 0 : i32
    %c0_i32_1 = arith.constant 0 : i32
    return %c0_i32, %c0_i32_0 : i32, i32
  }
  func.func @transform_4(%arg0: i32, %arg1: i32) -> (i32, i32) {
    %c0_i32 = arith.constant 0 : i32
    %c0_i32_0 = arith.constant 0 : i32
    return %arg0, %c0_i32 : i32, i32
  }
}

module attributes {stable_mosaic.version = 11 : i64} {
  func.func @_agg_kernel(%arg0: i32, %arg1: i32, %arg2: memref<128x384xbf16, #tpu.memory_space<vmem>>, %arg3: memref<384x128xbf16, #tpu.memory_space<vmem>>, %arg4: memref<128x128xf32, #tpu.memory_space<vmem>>, %arg5: memref<1x128xf32, #tpu.memory_space<vmem>>, %arg6: memref<128x128xf32, #tpu.memory_space<vmem>>, %arg7: memref<128x128xf32, #tpu.memory_space<vmem>>) attributes {dimension_semantics = [#tpu.dimension_semantics<parallel>, #tpu.dimension_semantics<arbitrary>], iteration_bounds = array<i64: 1, 1>, scalar_prefetch = 0 : i64, scratch_operands = 1 : i64, tpu.core_type = #tpu.core_type<tc>, window_params = [{transform_indices = @transform_0, window_bounds = array<i64: 128, 384>}, {transform_indices = @transform_1, window_bounds = array<i64: 384, 128>}, {transform_indices = @transform_2, window_bounds = array<i64: 128, 128>}, {pipeline_mode = #tpu.pipeline_mode<synchronous>, transform_indices = @transform_3, window_bounds = array<i64: 1, 128>}, {transform_indices = @transform_4, window_bounds = array<i64: 128, 128>}]} {
    %c0_i32 = arith.constant 0 : i32
    %0 = arith.cmpi eq, %arg1, %c0_i32 : i32
    %1 = arith.extui %0 : i1 to i32
    %c0_i32_0 = arith.constant 0 : i32
    %2 = arith.cmpi ne, %1, %c0_i32_0 : i32
    scf.if %2 {
      %cst_10 = arith.constant 0.000000e+00 : f32
      %12 = vector.broadcast %cst_10 : f32 to vector<128x128xf32>
      %c0_11 = arith.constant 0 : index
      %c0_12 = arith.constant 0 : index
      %13 = vector.load %arg7[%c0_11, %c0_12] : memref<128x128xf32, #tpu.memory_space<vmem>>, vector<128x128xf32>
      tpu.vector_store %arg7[%c0_11, %c0_12], %12 {strides = array<i32>} : memref<128x128xf32, #tpu.memory_space<vmem>>, vector<128x128xf32>,
    } else {
    }
    %c0 = arith.constant 0 : index
    %c0_1 = arith.constant 0 : index
    %3 = vector.load %arg7[%c0, %c0_1] : memref<128x128xf32, #tpu.memory_space<vmem>>, vector<128x128xf32>
    %c0_2 = arith.constant 0 : index
    %c0_3 = arith.constant 0 : index
    %4 = vector.load %arg2[%c0_2, %c0_3] : memref<128x384xbf16, #tpu.memory_space<vmem>>, vector<128x384xbf16>
    %c0_4 = arith.constant 0 : index
    %c0_5 = arith.constant 0 : index
    %5 = vector.load %arg3[%c0_4, %c0_5] : memref<384x128xbf16, #tpu.memory_space<vmem>>, vector<384x128xbf16>
    %cst = arith.constant dense<0.000000e+00> : vector<128x128xf32>
    %6 = tpu.matmul %4, %5, %cst {dimension_numbers = #tpu.dot_dimension_numbers<[1], [0], [0], [1], [0, 0, 1, 1], [], []>} : vector<128x384xbf16>, vector<384x128xbf16>, vector<128x128xf32> -> vector<128x128xf32>
    %7 = arith.addf %3, %6 : vector<128x128xf32>
    %c0_6 = arith.constant 0 : index
    %c0_7 = arith.constant 0 : index
    %8 = vector.load %arg7[%c0_6, %c0_7] : memref<128x128xf32, #tpu.memory_space<vmem>>, vector<128x128xf32>
    tpu.vector_store %arg7[%c0_6, %c0_7], %7 {strides = array<i32>} : memref<128x128xf32, #tpu.memory_space<vmem>>, vector<128x128xf32>,
    %c0_i32_8 = arith.constant 0 : i32
    %9 = arith.cmpi eq, %arg1, %c0_i32_8 : i32
    %10 = arith.extui %9 : i1 to i32
    %c0_i32_9 = arith.constant 0 : i32
    %11 = arith.cmpi ne, %10, %c0_i32_9 : i32
    scf.if %11 {
      %c0_10 = arith.constant 0 : index
      %c0_11 = arith.constant 0 : index
      %12 = vector.load %arg7[%c0_10, %c0_11] : memref<128x128xf32, #tpu.memory_space<vmem>>, vector<128x128xf32>
      %c0_12 = arith.constant 0 : index
      %c0_13 = arith.constant 0 : index
      %13 = vector.load %arg5[%c0_12, %c0_13] : memref<1x128xf32, #tpu.memory_space<vmem>>, vector<1x128xf32>
      %14 = vector.broadcast %13 : vector<1x128xf32> to vector<128x128xf32>
      %15 = arith.addf %12, %14 : vector<128x128xf32>
      %c0_14 = arith.constant 0 : index
      %c0_15 = arith.constant 0 : index
      %16 = vector.load %arg4[%c0_14, %c0_15] : memref<128x128xf32, #tpu.memory_space<vmem>>, vector<128x128xf32>
      %cst_16 = arith.constant 5.000000e-01 : f32
      %17 = vector.broadcast %cst_16 : f32 to vector<128x128xf32>
      %18 = arith.mulf %17, %16 : vector<128x128xf32>
      %19 = arith.addf %15, %18 : vector<128x128xf32>
      %cst_17 = arith.constant 0.000000e+00 : f32
      %20 = vector.broadcast %cst_17 : f32 to vector<128x128xf32>
      %21 = arith.cmpf oge, %19, %20 : vector<128x128xf32>
      %cst_18 = arith.constant 0.00999999977 : f32
      %22 = vector.broadcast %cst_18 : f32 to vector<128x128xf32>
      %23 = arith.mulf %22, %19 : vector<128x128xf32>
      %24 = arith.select %21, %19, %23 : vector<128x128xi1>, vector<128x128xf32>
      %c0_19 = arith.constant 0 : index
      %c0_20 = arith.constant 0 : index
      %25 = vector.load %arg6[%c0_19, %c0_20] : memref<128x128xf32, #tpu.memory_space<vmem>>, vector<128x128xf32>
      tpu.vector_store %arg6[%c0_19, %c0_20], %24 {strides = array<i32>} : memref<128x128xf32, #tpu.memory_space<vmem>>, vector<128x128xf32>,
    } else {
    }
    return
  }
  func.func @transform_0(%arg0: i32, %arg1: i32) -> (i32, i32) {
    %c0_i32 = arith.constant 0 : i32
    return %arg0, %arg1 : i32, i32
  }
  func.func @transform_1(%arg0: i32, %arg1: i32) -> (i32, i32) {
    %c0_i32 = arith.constant 0 : i32
    %c0_i32_0 = arith.constant 0 : i32
    return %arg1, %c0_i32 : i32, i32
  }
  func.func @transform_2(%arg0: i32, %arg1: i32) -> (i32, i32) {
    %c0_i32 = arith.constant 0 : i32
    %c0_i32_0 = arith.constant 0 : i32
    return %arg0, %c0_i32 : i32, i32
  }
  func.func @transform_3(%arg0: i32, %arg1: i32) -> (i32, i32) {
    %c0_i32 = arith.constant 0 : i32
    %c0_i32_0 = arith.constant 0 : i32
    %c0_i32_1 = arith.constant 0 : i32
    return %c0_i32, %c0_i32_0 : i32, i32
  }
  func.func @transform_4(%arg0: i32, %arg1: i32) -> (i32, i32) {
    %c0_i32 = arith.constant 0 : i32
    %c0_i32_0 = arith.constant 0 : i32
    return %arg0, %c0_i32 : i32, i32
  }
}

module attributes {stable_mosaic.version = 11 : i64} {
  func.func @_prep1_kernel(%arg0: memref<128x128xf32, #tpu.memory_space<vmem>>, %arg1: memref<128x128xf32, #tpu.memory_space<vmem>>, %arg2: memref<128x128xf32, #tpu.memory_space<vmem>>, %arg3: memref<128x128xbf16, #tpu.memory_space<vmem>>, %arg4: memref<1x128xf32, #tpu.memory_space<vmem>>, %arg5: memref<128x128xbf16, #tpu.memory_space<vmem>>, %arg6: memref<1x128xf32, #tpu.memory_space<vmem>>, %arg7: memref<128x128xbf16, #tpu.memory_space<vmem>>, %arg8: memref<128x128xbf16, #tpu.memory_space<vmem>>, %arg9: memref<128x384xbf16, #tpu.memory_space<vmem>>, %arg10: memref<128x128xf32, #tpu.memory_space<vmem>>, %arg11: memref<128x128xf32, #tpu.memory_space<vmem>>, %arg12: memref<384x128xbf16, #tpu.memory_space<vmem>>, %arg13: memref<128x128xbf16, #tpu.memory_space<vmem>>, %arg14: memref<128x128xbf16, #tpu.memory_space<vmem>>) attributes {dimension_semantics = [], scalar_prefetch = 0 : i64, scratch_operands = 0 : i64, tpu.core_type = #tpu.core_type<tc>} {
    %c0 = arith.constant 0 : index
    %c0_0 = arith.constant 0 : index
    %0 = vector.load %arg0[%c0, %c0_0] : memref<128x128xf32, #tpu.memory_space<vmem>>, vector<128x128xf32>
    %1 = arith.truncf %0 : vector<128x128xf32> to vector<128x128xbf16>
    %c0_1 = arith.constant 0 : index
    %c0_2 = arith.constant 0 : index
    %2 = vector.load %arg3[%c0_1, %c0_2] : memref<128x128xbf16, #tpu.memory_space<vmem>>, vector<128x128xbf16>
    %cst = arith.constant dense<0.000000e+00> : vector<128x128xf32>
    %3 = tpu.matmul %1, %2, %cst {dimension_numbers = #tpu.dot_dimension_numbers<[1], [0], [0], [1], [0, 0, 1, 1], [], []>} : vector<128x128xbf16>, vector<128x128xbf16>, vector<128x128xf32> -> vector<128x128xf32>
    %c0_3 = arith.constant 0 : index
    %c0_4 = arith.constant 0 : index
    %4 = vector.load %arg4[%c0_3, %c0_4] : memref<1x128xf32, #tpu.memory_space<vmem>>, vector<1x128xf32>
    %5 = vector.broadcast %4 : vector<1x128xf32> to vector<128x128xf32>
    %6 = arith.addf %3, %5 : vector<128x128xf32>
    %cst_5 = arith.constant 0.000000e+00 : f32
    %7 = vector.broadcast %cst_5 : f32 to vector<128x128xf32>
    %8 = arith.cmpf oge, %6, %7 : vector<128x128xf32>
    %cst_6 = arith.constant 0.00999999977 : f32
    %9 = vector.broadcast %cst_6 : f32 to vector<128x128xf32>
    %10 = arith.mulf %9, %6 : vector<128x128xf32>
    %11 = arith.select %8, %6, %10 : vector<128x128xi1>, vector<128x128xf32>
    %c0_7 = arith.constant 0 : index
    %c0_8 = arith.constant 0 : index
    %12 = vector.load %arg1[%c0_7, %c0_8] : memref<128x128xf32, #tpu.memory_space<vmem>>, vector<128x128xf32>
    %13 = arith.truncf %12 : vector<128x128xf32> to vector<128x128xbf16>
    %c0_9 = arith.constant 0 : index
    %c0_10 = arith.constant 0 : index
    %14 = vector.load %arg5[%c0_9, %c0_10] : memref<128x128xbf16, #tpu.memory_space<vmem>>, vector<128x128xbf16>
    %cst_11 = arith.constant dense<0.000000e+00> : vector<128x128xf32>
    %15 = tpu.matmul %13, %14, %cst_11 {dimension_numbers = #tpu.dot_dimension_numbers<[1], [0], [0], [1], [0, 0, 1, 1], [], []>} : vector<128x128xbf16>, vector<128x128xbf16>, vector<128x128xf32> -> vector<128x128xf32>
    %c0_12 = arith.constant 0 : index
    %c0_13 = arith.constant 0 : index
    %16 = vector.load %arg6[%c0_12, %c0_13] : memref<1x128xf32, #tpu.memory_space<vmem>>, vector<1x128xf32>
    %17 = vector.broadcast %16 : vector<1x128xf32> to vector<128x128xf32>
    %18 = arith.addf %15, %17 : vector<128x128xf32>
    %cst_14 = arith.constant 0.000000e+00 : f32
    %19 = vector.broadcast %cst_14 : f32 to vector<128x128xf32>
    %20 = arith.cmpf oge, %18, %19 : vector<128x128xf32>
    %cst_15 = arith.constant 0.00999999977 : f32
    %21 = vector.broadcast %cst_15 : f32 to vector<128x128xf32>
    %22 = arith.mulf %21, %18 : vector<128x128xf32>
    %23 = arith.select %20, %18, %22 : vector<128x128xi1>, vector<128x128xf32>
    %c0_16 = arith.constant 0 : index
    %c0_17 = arith.constant 0 : index
    %24 = vector.load %arg10[%c0_16, %c0_17] : memref<128x128xf32, #tpu.memory_space<vmem>>, vector<128x128xf32>
    tpu.vector_store %arg10[%c0_16, %c0_17], %11 {strides = array<i32>} : memref<128x128xf32, #tpu.memory_space<vmem>>, vector<128x128xf32>,
    %c0_18 = arith.constant 0 : index
    %c0_19 = arith.constant 0 : index
    %25 = vector.load %arg11[%c0_18, %c0_19] : memref<128x128xf32, #tpu.memory_space<vmem>>, vector<128x128xf32>
    tpu.vector_store %arg11[%c0_18, %c0_19], %23 {strides = array<i32>} : memref<128x128xf32, #tpu.memory_space<vmem>>, vector<128x128xf32>,
    %26 = arith.truncf %11 : vector<128x128xf32> to vector<128x128xbf16>
    %27 = arith.truncf %23 : vector<128x128xf32> to vector<128x128xbf16>
    %c0_20 = arith.constant 0 : index
    %c0_21 = arith.constant 0 : index
    %28 = vector.load %arg2[%c0_20, %c0_21] : memref<128x128xf32, #tpu.memory_space<vmem>>, vector<128x128xf32>
    %29 = arith.truncf %28 : vector<128x128xf32> to vector<128x128xbf16>
    %c0_22 = arith.constant 0 : index
    %c0_23 = arith.constant 0 : index
    %30 = vector.load %arg7[%c0_22, %c0_23] : memref<128x128xbf16, #tpu.memory_space<vmem>>, vector<128x128xbf16>
    %cst_24 = arith.constant dense<0.000000e+00> : vector<128x128xf32>
    %31 = tpu.matmul %26, %30, %cst_24 {dimension_numbers = #tpu.dot_dimension_numbers<[1], [0], [0], [1], [0, 0, 1, 1], [], []>} : vector<128x128xbf16>, vector<128x128xbf16>, vector<128x128xf32> -> vector<128x128xf32>
    %32 = arith.truncf %31 : vector<128x128xf32> to vector<128x128xbf16>
    %c0_25 = arith.constant 0 : index
    %c0_26 = arith.constant 0 : index
    %33 = vector.load %arg12[%c0_25, %c0_26] : memref<384x128xbf16, #tpu.memory_space<vmem>>, vector<128x128xbf16>
    tpu.vector_store %arg12[%c0_25, %c0_26], %32 {strides = array<i32>} : memref<384x128xbf16, #tpu.memory_space<vmem>>, vector<128x128xbf16>,
    %c0_27 = arith.constant 0 : index
    %c0_28 = arith.constant 0 : index
    %34 = vector.load %arg8[%c0_27, %c0_28] : memref<128x128xbf16, #tpu.memory_space<vmem>>, vector<128x128xbf16>
    %cst_29 = arith.constant dense<0.000000e+00> : vector<128x128xf32>
    %35 = tpu.matmul %27, %34, %cst_29 {dimension_numbers = #tpu.dot_dimension_numbers<[1], [0], [0], [1], [0, 0, 1, 1], [], []>} : vector<128x128xbf16>, vector<128x128xbf16>, vector<128x128xf32> -> vector<128x128xf32>
    %36 = arith.truncf %35 : vector<128x128xf32> to vector<128x128xbf16>
    %c128 = arith.constant 128 : index
    %c0_30 = arith.constant 0 : index
    %37 = vector.load %arg12[%c128, %c0_30] : memref<384x128xbf16, #tpu.memory_space<vmem>>, vector<128x128xbf16>
    tpu.vector_store %arg12[%c128, %c0_30], %36 {strides = array<i32>} : memref<384x128xbf16, #tpu.memory_space<vmem>>, vector<128x128xbf16>,
    %c0_31 = arith.constant 0 : index
    %c0_32 = arith.constant 0 : index
    %38 = vector.load %arg9[%c0_31, %c0_32] : memref<128x384xbf16, #tpu.memory_space<vmem>>, vector<128x384xbf16>
    %cst_33 = arith.constant dense<0.000000e+00> : vector<128x384xf32>
    %39 = tpu.matmul %29, %38, %cst_33 {dimension_numbers = #tpu.dot_dimension_numbers<[1], [0], [0], [1], [0, 0, 1, 1], [], []>} : vector<128x128xbf16>, vector<128x384xbf16>, vector<128x384xf32> -> vector<128x384xf32>
    %40 = vector.extract_strided_slice %39 {offsets = [0, 0], sizes = [128, 128], strides = [1, 1]} : vector<128x384xf32> to vector<128x128xf32>
    %41 = arith.truncf %40 : vector<128x128xf32> to vector<128x128xbf16>
    %c0_34 = arith.constant 0 : index
    %c0_35 = arith.constant 0 : index
    %42 = vector.load %arg13[%c0_34, %c0_35] : memref<128x128xbf16, #tpu.memory_space<vmem>>, vector<128x128xbf16>
    tpu.vector_store %arg13[%c0_34, %c0_35], %41 {strides = array<i32>} : memref<128x128xbf16, #tpu.memory_space<vmem>>, vector<128x128xbf16>,
    %43 = vector.extract_strided_slice %39 {offsets = [0, 128], sizes = [128, 128], strides = [1, 1]} : vector<128x384xf32> to vector<128x128xf32>
    %44 = arith.truncf %43 : vector<128x128xf32> to vector<128x128xbf16>
    %c0_36 = arith.constant 0 : index
    %c0_37 = arith.constant 0 : index
    %45 = vector.load %arg14[%c0_36, %c0_37] : memref<128x128xbf16, #tpu.memory_space<vmem>>, vector<128x128xbf16>
    tpu.vector_store %arg14[%c0_36, %c0_37], %44 {strides = array<i32>} : memref<128x128xbf16, #tpu.memory_space<vmem>>, vector<128x128xbf16>,
    %46 = vector.extract_strided_slice %39 {offsets = [0, 256], sizes = [128, 128], strides = [1, 1]} : vector<128x384xf32> to vector<128x128xf32>
    %47 = arith.truncf %46 : vector<128x128xf32> to vector<128x128xbf16>
    %c256 = arith.constant 256 : index
    %c0_38 = arith.constant 0 : index
    %48 = vector.load %arg12[%c256, %c0_38] : memref<384x128xbf16, #tpu.memory_space<vmem>>, vector<128x128xbf16>
    tpu.vector_store %arg12[%c256, %c0_38], %47 {strides = array<i32>} : memref<384x128xbf16, #tpu.memory_space<vmem>>, vector<128x128xbf16>,
    return
  }
}

module attributes {stable_mosaic.version = 11 : i64} {
  func.func @_head_kernel(%arg0: memref<16x128xf32, #tpu.memory_space<vmem>>, %arg1: memref<16x128xf32, #tpu.memory_space<vmem>>, %arg2: memref<128x128xbf16, #tpu.memory_space<vmem>>, %arg3: memref<1x128xf32, #tpu.memory_space<vmem>>, %arg4: memref<128x128xbf16, #tpu.memory_space<vmem>>, %arg5: memref<128x128xbf16, #tpu.memory_space<vmem>>, %arg6: memref<1x128xf32, #tpu.memory_space<vmem>>, %arg7: memref<128x128xbf16, #tpu.memory_space<vmem>>, %arg8: memref<1x128xf32, #tpu.memory_space<vmem>>, %arg9: memref<16x128xf32, #tpu.memory_space<vmem>>) attributes {dimension_semantics = [], scalar_prefetch = 0 : i64, scratch_operands = 0 : i64, tpu.core_type = #tpu.core_type<tc>} {
    %c0 = arith.constant 0 : index
    %c0_0 = arith.constant 0 : index
    %0 = vector.load %arg0[%c0, %c0_0] : memref<16x128xf32, #tpu.memory_space<vmem>>, vector<16x128xf32>
    %1 = arith.truncf %0 : vector<16x128xf32> to vector<16x128xbf16>
    %c0_1 = arith.constant 0 : index
    %c0_2 = arith.constant 0 : index
    %2 = vector.load %arg2[%c0_1, %c0_2] : memref<128x128xbf16, #tpu.memory_space<vmem>>, vector<128x128xbf16>
    %cst = arith.constant dense<0.000000e+00> : vector<16x128xf32>
    %3 = tpu.matmul %1, %2, %cst {dimension_numbers = #tpu.dot_dimension_numbers<[1], [0], [0], [1], [0, 0, 1, 1], [], []>} : vector<16x128xbf16>, vector<128x128xbf16>, vector<16x128xf32> -> vector<16x128xf32>
    %c0_3 = arith.constant 0 : index
    %c0_4 = arith.constant 0 : index
    %4 = vector.load %arg3[%c0_3, %c0_4] : memref<1x128xf32, #tpu.memory_space<vmem>>, vector<1x128xf32>
    %5 = vector.broadcast %4 : vector<1x128xf32> to vector<16x128xf32>
    %6 = arith.addf %3, %5 : vector<16x128xf32>
    %cst_5 = arith.constant 0.000000e+00 : f32
    %7 = vector.broadcast %cst_5 : f32 to vector<16x128xf32>
    %8 = arith.cmpf oge, %6, %7 : vector<16x128xf32>
    %cst_6 = arith.constant 0.00999999977 : f32
    %9 = vector.broadcast %cst_6 : f32 to vector<16x128xf32>
    %10 = arith.mulf %9, %6 : vector<16x128xf32>
    %11 = arith.select %8, %6, %10 : vector<16x128xi1>, vector<16x128xf32>
    %12 = arith.truncf %11 : vector<16x128xf32> to vector<16x128xbf16>
    %c0_7 = arith.constant 0 : index
    %c0_8 = arith.constant 0 : index
    %13 = vector.load %arg4[%c0_7, %c0_8] : memref<128x128xbf16, #tpu.memory_space<vmem>>, vector<128x128xbf16>
    %cst_9 = arith.constant dense<0.000000e+00> : vector<16x128xf32>
    %14 = tpu.matmul %12, %13, %cst_9 {dimension_numbers = #tpu.dot_dimension_numbers<[1], [0], [0], [1], [0, 0, 1, 1], [], []>} : vector<16x128xbf16>, vector<128x128xbf16>, vector<16x128xf32> -> vector<16x128xf32>
    %c0_10 = arith.constant 0 : index
    %c0_11 = arith.constant 0 : index
    %15 = vector.load %arg1[%c0_10, %c0_11] : memref<16x128xf32, #tpu.memory_space<vmem>>, vector<16x128xf32>
    %16 = arith.truncf %15 : vector<16x128xf32> to vector<16x128xbf16>
    %c0_12 = arith.constant 0 : index
    %c0_13 = arith.constant 0 : index
    %17 = vector.load %arg5[%c0_12, %c0_13] : memref<128x128xbf16, #tpu.memory_space<vmem>>, vector<128x128xbf16>
    %cst_14 = arith.constant dense<0.000000e+00> : vector<16x128xf32>
    %18 = tpu.matmul %16, %17, %cst_14 {dimension_numbers = #tpu.dot_dimension_numbers<[1], [0], [0], [1], [0, 0, 1, 1], [], []>} : vector<16x128xbf16>, vector<128x128xbf16>, vector<16x128xf32> -> vector<16x128xf32>
    %19 = arith.addf %14, %18 : vector<16x128xf32>
    %c0_15 = arith.constant 0 : index
    %c0_16 = arith.constant 0 : index
    %20 = vector.load %arg6[%c0_15, %c0_16] : memref<1x128xf32, #tpu.memory_space<vmem>>, vector<1x128xf32>
    %21 = vector.broadcast %20 : vector<1x128xf32> to vector<16x128xf32>
    %22 = arith.addf %19, %21 : vector<16x128xf32>
    %cst_17 = arith.constant 0.000000e+00 : f32
    %23 = vector.broadcast %cst_17 : f32 to vector<16x128xf32>
    %24 = arith.cmpf oge, %22, %23 : vector<16x128xf32>
    %cst_18 = arith.constant 0.00999999977 : f32
    %25 = vector.broadcast %cst_18 : f32 to vector<16x128xf32>
    %26 = arith.mulf %25, %22 : vector<16x128xf32>
    %27 = arith.select %24, %22, %26 : vector<16x128xi1>, vector<16x128xf32>
    %28 = arith.truncf %27 : vector<16x128xf32> to vector<16x128xbf16>
    %c0_19 = arith.constant 0 : index
    %c0_20 = arith.constant 0 : index
    %29 = vector.load %arg7[%c0_19, %c0_20] : memref<128x128xbf16, #tpu.memory_space<vmem>>, vector<128x128xbf16>
    %cst_21 = arith.constant dense<0.000000e+00> : vector<16x128xf32>
    %30 = tpu.matmul %28, %29, %cst_21 {dimension_numbers = #tpu.dot_dimension_numbers<[1], [0], [0], [1], [0, 0, 1, 1], [], []>} : vector<16x128xbf16>, vector<128x128xbf16>, vector<16x128xf32> -> vector<16x128xf32>
    %c0_22 = arith.constant 0 : index
    %c0_23 = arith.constant 0 : index
    %31 = vector.load %arg8[%c0_22, %c0_23] : memref<1x128xf32, #tpu.memory_space<vmem>>, vector<1x128xf32>
    %32 = vector.broadcast %31 : vector<1x128xf32> to vector<16x128xf32>
    %33 = arith.addf %30, %32 : vector<16x128xf32>
    %c0_24 = arith.constant 0 : index
    %c0_25 = arith.constant 0 : index
    %34 = vector.load %arg9[%c0_24, %c0_25] : memref<16x128xf32, #tpu.memory_space<vmem>>, vector<16x128xf32>
    tpu.vector_store %arg9[%c0_24, %c0_25], %33 {strides = array<i32>} : memref<16x128xf32, #tpu.memory_space<vmem>>, vector<16x128xf32>,
    return
  }
}

</mosaic_0001>

<bundles_post_ra>
// kernel: model_forward.9
= control target key start
LH: loop header
LB: loop body
LE: loop exit
PB: predicated region body
PF: predicated region fallthrough
CT: control target
= control target key end

     0   :  { %s551_s1 = inlined_call_operand.vmem [shape: bf16[128,128], index: 1, kind: input, shape index: {}]   ;;  %s552_s0 = inlined_call_operand.vmem [shape: f32[128,128], index: 0, kind: input, shape index: {}]   ;;  %s553_s2 = inlined_call_operand.vmem [shape: bf16[128,128], index: 2, kind: output, shape index: {}]  }
   0x1   :  { %v432_v0 = vld [vmem:[%s551_s1] sm:$0xff]   ;;  %v433_v1 = vld [vmem:[%s551_s1 + $0x8] sm:$0xff]   ;;  %v434_v2 = vld [vmem:[%s551_s1 + $0x10] sm:$0xff]  }
   0x2   :  { %384 = vmatprep.subr.bf16.mxu0 %v432_v0  ;;  %416 = vmatprep.subr.bf16.mxu1 %v432_v0  ;;  %v435_v3 = vld [vmem:[%s551_s1 + $0x18] sm:$0xff]   ;;  %v12_v4 = vld [vmem:[%s552_s0] sm:$0xff]  ;;  %v13_v5 = vld [vmem:[%s552_s0 + $0x8] sm:$0xff] }
   0x3   :  { %385 = vmatpush3.bf16.msra.mxu0 %v432_v0  ;;  %424 = vmatpush3.bf16.msra.mxu1 %v432_v0  ;;  %v20_v6 = vld [vmem:[%s552_s0 + $0x40] sm:$0xff]  ;;  %v28_v7 = vpack.c.bf16 %v13_v5, %v12_v4  ;;  %v21_v8 = vld [vmem:[%s552_s0 + $0x48] sm:$0xff]  ;;  %v438_v12 = vld [vmem:[%s551_s1 + $0x30] sm:$0xff]  }
   0x4   :  { %386 = vmatprep.subr.bf16.mxu0 %v433_v1  ;;  %417 = vmatprep.subr.bf16.mxu1 %v433_v1  ;;  %v32_v9 = vpack.c.bf16 %v21_v8, %v20_v6  ;;  %v436_v10 = vld [vmem:[%s551_s1 + $0x20] sm:$0xff]   ;;  %v437_v11 = vld [vmem:[%s551_s1 + $0x28] sm:$0xff]   ;;  %v439_v13 = vld [vmem:[%s551_s1 + $0x38] sm:$0xff]  }
   0x5   :  { %400 = vmatprep.mubr.bf16.mxu0 %v28_v7  ;;  %v14_v14 = vld [vmem:[%s552_s0 + $0x10] sm:$0xff]  ;;  %v15_v15 = vld [vmem:[%s552_s0 + $0x18] sm:$0xff]  ;;  %v16_v18 = vld [vmem:[%s552_s0 + $0x20] sm:$0xff] }
   0x6   :  { %408 = vmatprep.mubr.bf16.mxu1 %v32_v9  ;;  %v22_v16 = vld [vmem:[%s552_s0 + $0x50] sm:$0xff]  ;;  %v23_v17 = vld [vmem:[%s552_s0 + $0x58] sm:$0xff]  ;;  %v17_v19 = vld [vmem:[%s552_s0 + $0x28] sm:$0xff]  ;;  %v29_v22 = vpack.c.bf16 %v15_v15, %v14_v14 }
   0x7   :  { %387 = vmatpush3.bf16.msra.mxu0 %v433_v1  ;;  %425 = vmatpush3.bf16.msra.mxu1 %v433_v1  ;;  %v24_v20 = vld [vmem:[%s552_s0 + $0x60] sm:$0xff]  ;;  %v25_v21 = vld [vmem:[%s552_s0 + $0x68] sm:$0xff]  ;;  %v33_v23 = vpack.c.bf16 %v23_v17, %v22_v16  ;;  %v30_v24 = vpack.c.bf16 %v17_v19, %v16_v18  ;;  %v18_v26 = vld [vmem:[%s552_s0 + $0x30] sm:$0xff] }
   0x8   :  { %388 = vmatprep.subr.bf16.mxu0 %v434_v2  ;;  %418 = vmatprep.subr.bf16.mxu1 %v434_v2  ;;  %v34_v25 = vpack.c.bf16 %v25_v21, %v24_v20  ;;  %v19_v27 = vld [vmem:[%s552_s0 + $0x38] sm:$0xff]  ;;  %v26_v28 = vld [vmem:[%s552_s0 + $0x70] sm:$0xff] }
   0x9   :  { %v27_v29 = vld [vmem:[%s552_s0 + $0x78] sm:$0xff]  ;;  %v31_v30 = vpack.c.bf16 %v19_v27, %v18_v26 }
   0xa   :  { %v35_v31 = vpack.c.bf16 %v27_v29, %v26_v28 }
   0xb   :  { %389 = vmatpush3.bf16.msra.mxu0 %v434_v2  ;;  %426 = vmatpush3.bf16.msra.mxu1 %v434_v2 }
   0xc   :  { %390 = vmatprep.subr.bf16.mxu0 %v435_v3  ;;  %419 = vmatprep.subr.bf16.mxu1 %v435_v3 }
   0xf   :  { %391 = vmatpush3.bf16.msra.mxu0 %v435_v3  ;;  %427 = vmatpush3.bf16.msra.mxu1 %v435_v3 }
  0x10   :  { %392 = vmatprep.subr.bf16.mxu0 %v436_v10  ;;  %420 = vmatprep.subr.bf16.mxu1 %v436_v10 }
  0x13   :  { %393 = vmatpush3.bf16.msra.mxu0 %v436_v10  ;;  %428 = vmatpush3.bf16.msra.mxu1 %v436_v10 }
  0x14   :  { %394 = vmatprep.subr.bf16.mxu0 %v437_v11  ;;  %421 = vmatprep.subr.bf16.mxu1 %v437_v11 }
  0x17   :  { %395 = vmatpush3.bf16.msra.mxu0 %v437_v11  ;;  %429 = vmatpush3.bf16.msra.mxu1 %v437_v11 }
  0x18   :  { %396 = vmatprep.subr.bf16.mxu0 %v438_v12  ;;  %422 = vmatprep.subr.bf16.mxu1 %v438_v12 }
  0x1b   :  { %397 = vmatpush3.bf16.msra.mxu0 %v438_v12  ;;  %430 = vmatpush3.bf16.msra.mxu1 %v438_v12 }
  0x1c   :  { %398 = vmatprep.subr.bf16.mxu0 %v439_v13  ;;  %423 = vmatprep.subr.bf16.mxu1 %v439_v13 }
  0x1f   :  { %399 = vmatpush3.bf16.msra.mxu0 %v439_v13  ;;  %431 = vmatpush3.bf16.msra.mxu1 %v439_v13 }
  0x22   :  { %401 = vmatmul.mubr.bf16.vlgmr.msra.gmra.mrb[0].mxu0 %v29_v22  ;;  %409 = vmatmul.mubr.bf16.vlgmr.msra.gmra.mrb[0].mxu1 %v33_v23 }
  0x23   :  { %404 = vmatprep.mubr.bf16.mxu0 %v30_v24  ;;  %412 = vmatprep.mubr.bf16.mxu1 %v34_v25 }
  0x2a   :  { %405 = vmatmul.mubr.bf16.gmra.mrb[4].mxu0 %v31_v30  ;;  %413 = vmatmul.mubr.bf16.gmra.mrb[4].mxu1 %v35_v31 }
  0xf5   :  { %v402_v32 = vpop.f32.mrb[0].mxu0  ;;  %v410_v33 = vpop.f32.mrb[0].mxu1 }
  0xf6   :  { %v134_v34 = vpop.f32.mrb[1].mxu0  ;;  %v166_v35 = vpop.f32.mrb[1].mxu1 }
  0xf7   :  { %v403_v36 = vpop.f32.mrb[2].mxu0  ;;  %v411_v37 = vpop.f32.mrb[2].mxu1 }
  0xf8   :  { %v329_v38 = vpack.c.bf16 %v403_v36, %v402_v32  ;;  %v349_v39 = vpack.c.bf16 %v411_v37, %v410_v33  ;;  %v137_v40 = vpop.f32.mrb[3].mxu0  ;;  %v169_v41 = vpop.f32.mrb[3].mxu1 }
  0xf9   :  { %v324_v42 = vpack.c.bf16 %v137_v40, %v134_v34  ;;  %v344_v43 = vpack.c.bf16 %v169_v41, %v166_v35 }
  0xfa   :  { %361 = vst [vmem:[%s553_s2 + $0x8] sm:$0xff] %v329_v38   ;;  %365 = vst [vmem:[%s553_s2 + $0x28] sm:$0xff] %v349_v39  }
  0xfb   :  { %325 = vst [vmem:[%s553_s2] sm:$0xff] %v324_v42   ;;  %364 = vst [vmem:[%s553_s2 + $0x20] sm:$0xff] %v344_v43  }
  0xfd   :  { %v406_v44 = vpop.f32.mrb[4].mxu0  ;;  %v414_v45 = vpop.f32.mrb[4].mxu1 }
  0xfe   :  { %v150_v46 = vpop.f32.mrb[5].mxu0  ;;  %v182_v47 = vpop.f32.mrb[5].mxu1 }
  0xff   :  { %v407_v48 = vpop.f32.mrb[6].mxu0  ;;  %v415_v49 = vpop.f32.mrb[6].mxu1 }
 0x100   :  { %v339_v50 = vpack.c.bf16 %v407_v48, %v406_v44  ;;  %v359_v51 = vpack.c.bf16 %v415_v49, %v414_v45  ;;  %v153_v52 = vpop.f32.mrb[7].mxu0  ;;  %v185_v53 = vpop.f32.mrb[7].mxu1 }
 0x101   :  { %v334_v54 = vpack.c.bf16 %v153_v52, %v150_v46  ;;  %v354_v55 = vpack.c.bf16 %v185_v53, %v182_v47 }
 0x102   :  { %363 = vst [vmem:[%s553_s2 + $0x18] sm:$0xff] %v339_v50   ;;  %367 = vst [vmem:[%s553_s2 + $0x38] sm:$0xff] %v359_v51  }
 0x103   :  { %362 = vst [vmem:[%s553_s2 + $0x10] sm:$0xff] %v334_v54   ;;  %366 = vst [vmem:[%s553_s2 + $0x30] sm:$0xff] %v354_v55  }

// kernel: model_forward.8
= control target key start
LH: loop header
LB: loop body
LE: loop exit
PB: predicated region body
PF: predicated region fallthrough
CT: control target
= control target key end

     0   :  { %s780_s1 = inlined_call_operand.vmem [shape: bf16[128,128], index: 1, kind: input, shape index: {}]   ;;  %s781_s0 = inlined_call_operand.vmem [shape: bf16[128,128], index: 0, kind: input, shape index: {}]   ;;  %s782_s2 = inlined_call_operand.vmem [shape: f32[128,128], index: 2, kind: input, shape index: {}]   ;;  %s783_s3 = inlined_call_operand.vmem [shape: f32[1,128], index: 3, kind: input, shape index: {}]   ;;  %s784_s4 = inlined_call_operand.vmem [shape: f32[128,128], index: 4, kind: output, shape index: {}]  }
   0x1   :  { %v550_v0 = vld [vmem:[%s780_s1] sm:$0xff]   ;;  %v551_v1 = vld [vmem:[%s780_s1 + $0x8] sm:$0xff]   ;;  %v552_v2 = vld [vmem:[%s780_s1 + $0x10] sm:$0xff]  }
   0x2   :  { %502 = vmatprep.subr.bf16.mxu0 %v550_v0  ;;  %534 = vmatprep.subr.bf16.mxu1 %v550_v0  ;;  %v553_v3 = vld [vmem:[%s780_s1 + $0x18] sm:$0xff]   ;;  %v558_v4 = vld [vmem:[%s781_s0] sm:$0xff]   ;;  %v555_v7 = vld [vmem:[%s780_s1 + $0x28] sm:$0xff]  }
   0x3   :  { %503 = vmatpush3.bf16.msra.mxu0 %v550_v0  ;;  %542 = vmatpush3.bf16.msra.mxu1 %v550_v0  ;;  %v559_v5 = vld [vmem:[%s781_s0 + $0x20] sm:$0xff]   ;;  %v556_v8 = vld [vmem:[%s780_s1 + $0x30] sm:$0xff]   ;;  %v557_v9 = vld [vmem:[%s780_s1 + $0x38] sm:$0xff]  }
   0x4   :  { %504 = vmatprep.subr.bf16.mxu0 %v551_v1  ;;  %535 = vmatprep.subr.bf16.mxu1 %v551_v1  ;;  %v554_v6 = vld [vmem:[%s780_s1 + $0x20] sm:$0xff]   ;;  %v560_v10 = vld [vmem:[%s781_s0 + $0x8] sm:$0xff]   ;;  %v562_v12 = vld [vmem:[%s781_s0 + $0x10] sm:$0xff]  }
   0x5   :  { %518 = vmatprep.mubr.bf16.mxu0 %v558_v4  ;;  %526 = vmatprep.mubr.bf16.mxu1 %v559_v5  ;;  %v561_v11 = vld [vmem:[%s781_s0 + $0x28] sm:$0xff]   ;;  %v563_v13 = vld [vmem:[%s781_s0 + $0x30] sm:$0xff]   ;;  %v564_v14 = vld [vmem:[%s781_s0 + $0x18] sm:$0xff]  }
   0x6   :  { %v565_v15 = vld [vmem:[%s781_s0 + $0x38] sm:$0xff]   ;;  %v355_v16 = vld [vmem:[%s782_s2 + $0x10] sm:$0xff]  ;;  %v353_v18 = vld [vmem:[%s782_s2] sm:$0xff] }
   0x7   :  { %505 = vmatpush3.bf16.msra.mxu0 %v551_v1  ;;  %543 = vmatpush3.bf16.msra.mxu1 %v551_v1  ;;  %v363_v17 = vld [vmem:[%s782_s2 + $0x50] sm:$0xff]  ;;  %v361_v19 = vld [vmem:[%s782_s2 + $0x40] sm:$0xff]  ;;  %v356_v20 = vld [vmem:[%s782_s2 + $0x18] sm:$0xff]  ;;  %v371_v29 = vmul.f32 0.5, %v355_v16  ;;  %v369_v31 = vmul.f32 0.5, %v353_v18 }
   0x8   :  { %506 = vmatprep.subr.bf16.mxu0 %v552_v2  ;;  %536 = vmatprep.subr.bf16.mxu1 %v552_v2  ;;  %v364_v21 = vld [vmem:[%s782_s2 + $0x58] sm:$0xff]  ;;  %v660_v22 = vld [vmem:[%s783_s3] ss:$0 sm:$0xff]  ;;  %v354_v23 = vld [vmem:[%s782_s2 + $0x8] sm:$0xff]  ;;  %v379_v30 = vmul.f32 0.5, %v363_v17  ;;  %v377_v32 = vmul.f32 0.5, %v361_v19 }
   0x9   :  { %v362_v24 = vld [vmem:[%s782_s2 + $0x48] sm:$0xff]  ;;  %v359_v25 = vld [vmem:[%s782_s2 + $0x30] sm:$0xff]  ;;  %v357_v27 = vld [vmem:[%s782_s2 + $0x20] sm:$0xff]  ;;  %v372_v35 = vmul.f32 0.5, %v356_v20  ;;  %v380_v36 = vmul.f32 0.5, %v364_v21  ;;  %v370_v37 = vmul.f32 0.5, %v354_v23 }
   0xa   :  { %v367_v26 = vld [vmem:[%s782_s2 + $0x70] sm:$0xff]  ;;  %v365_v28 = vld [vmem:[%s782_s2 + $0x60] sm:$0xff]  ;;  %v360_v33 = vld [vmem:[%s782_s2 + $0x38] sm:$0xff]  ;;  %v378_v38 = vmul.f32 0.5, %v362_v24  ;;  %v692_v43 = vmul.f32 0.5, %v359_v25  ;;  %v696_v45 = vmul.f32 0.5, %v357_v27 }
   0xb   :  { %507 = vmatpush3.bf16.msra.mxu0 %v552_v2  ;;  %544 = vmatpush3.bf16.msra.mxu1 %v552_v2  ;;  %v368_v34 = vld [vmem:[%s782_s2 + $0x78] sm:$0xff]  ;;  %v358_v39 = vld [vmem:[%s782_s2 + $0x28] sm:$0xff]  ;;  %v694_v44 = vmul.f32 0.5, %v367_v26  ;;  %v698_v46 = vmul.f32 0.5, %v365_v28  ;;  %v702_v51 = vmul.f32 0.5, %v360_v33 }
   0xc   :  { %508 = vmatprep.subr.bf16.mxu0 %v553_v3  ;;  %537 = vmatprep.subr.bf16.mxu1 %v553_v3  ;;  %v366_v40 = vld [vmem:[%s782_s2 + $0x68] sm:$0xff]  ;;  %v704_v52 = vmul.f32 0.5, %v368_v34  ;;  %v708_v57 = vmul.f32 0.5, %v358_v39 }
   0xd   :  { %v710_v58 = vmul.f32 0.5, %v366_v40 }
   0xf   :  { %509 = vmatpush3.bf16.msra.mxu0 %v553_v3  ;;  %545 = vmatpush3.bf16.msra.mxu1 %v553_v3 }
  0x10   :  { %510 = vmatprep.subr.bf16.mxu0 %v554_v6  ;;  %538 = vmatprep.subr.bf16.mxu1 %v554_v6 }
  0x13   :  { %511 = vmatpush3.bf16.msra.mxu0 %v554_v6  ;;  %546 = vmatpush3.bf16.msra.mxu1 %v554_v6 }
  0x14   :  { %512 = vmatprep.subr.bf16.mxu0 %v555_v7  ;;  %539 = vmatprep.subr.bf16.mxu1 %v555_v7 }
  0x17   :  { %513 = vmatpush3.bf16.msra.mxu0 %v555_v7  ;;  %547 = vmatpush3.bf16.msra.mxu1 %v555_v7 }
  0x18   :  { %514 = vmatprep.subr.bf16.mxu0 %v556_v8  ;;  %540 = vmatprep.subr.bf16.mxu1 %v556_v8 }
  0x1b   :  { %515 = vmatpush3.bf16.msra.mxu0 %v556_v8  ;;  %548 = vmatpush3.bf16.msra.mxu1 %v556_v8 }
  0x1c   :  { %516 = vmatprep.subr.bf16.mxu0 %v557_v9  ;;  %541 = vmatprep.subr.bf16.mxu1 %v557_v9 }
  0x1f   :  { %517 = vmatpush3.bf16.msra.mxu0 %v557_v9  ;;  %549 = vmatpush3.bf16.msra.mxu1 %v557_v9 }
  0x22   :  { %519 = vmatmul.mubr.bf16.vlgmr.msra.gmra.mrb[0].mxu0 %v560_v10  ;;  %527 = vmatmul.mubr.bf16.vlgmr.msra.gmra.mrb[0].mxu1 %v561_v11 }
  0x23   :  { %522 = vmatprep.mubr.bf16.mxu0 %v562_v12  ;;  %530 = vmatprep.mubr.bf16.mxu1 %v563_v13 }
  0x2a   :  { %523 = vmatmul.mubr.bf16.gmra.mrb[4].mxu0 %v564_v14  ;;  %531 = vmatmul.mubr.bf16.gmra.mrb[4].mxu1 %v565_v15 }
  0xf5   :  { %v520_v41 = vpop.f32.mrb[0].mxu0  ;;  %v528_v42 = vpop.f32.mrb[0].mxu1 }
  0xf6   :  { %v339_v47 = vadd.f32 %v520_v41, %v660_v22  ;;  %v347_v48 = vadd.f32 %v528_v42, %v660_v22  ;;  %v216_v49 = vpop.f32.mrb[1].mxu0  ;;  %v248_v50 = vpop.f32.mrb[1].mxu1 }
  0xf7   :  { %v337_v53 = vadd.f32 %v660_v22, %v216_v49  ;;  %v345_v54 = vadd.f32 %v660_v22, %v248_v50  ;;  %v521_v55 = vpop.f32.mrb[2].mxu0  ;;  %v529_v56 = vpop.f32.mrb[2].mxu1 }
  0xf8   :  { %v387_v59 = vadd.f32 %v371_v29, %v339_v47  ;;  %v395_v60 = vadd.f32 %v379_v30, %v347_v48  ;;  %v340_v61 = vadd.f32 %v521_v55, %v660_v22  ;;  %v348_v62 = vadd.f32 %v529_v56, %v660_v22  ;;  %v219_v63 = vpop.f32.mrb[3].mxu0  ;;  %v251_v0 = vpop.f32.mrb[3].mxu1 }
  0xf9   :  { %v385_v1 = vadd.f32 %v369_v31, %v337_v53  ;;  %v393_v2 = vadd.f32 %v377_v32, %v345_v54  ;;  %v338_v3 = vadd.f32 %v660_v22, %v219_v63  ;;  %v346_v4 = vadd.f32 %v660_v22, %v251_v0 }
  0xfa   :  { %vm403_vm0 = vcmp.ge.f32.partialorder %v387_v59, 0.0  ;;  %v419_v5 = vmul.f32 0.01, %v387_v59  ;;  %vm411_vm1 = vcmp.ge.f32.partialorder %v395_v60, 0.0  ;;  %v427_v6 = vmul.f32 0.01, %v395_v60 }
  0xfb   :  { %vm401_vm2 = vcmp.ge.f32.partialorder %v385_v1, 0.0  ;;  %v417_v7 = vmul.f32 0.01, %v385_v1  ;;  %vm409_vm3 = vcmp.ge.f32.partialorder %v393_v2, 0.0  ;;  %v425_v8 = vmul.f32 0.01, %v393_v2 }
  0xfc   :  { %v435_v9 = vsel %vm403_vm0, %v387_v59, %v419_v5  ;;  %v443_v10 = vsel %vm411_vm1, %v395_v60, %v427_v6  ;;  %v388_v11 = vadd.f32 %v372_v35, %v340_v61  ;;  %v396_v12 = vadd.f32 %v380_v36, %v348_v62 }
  0xfd   :  { %451 = vst [vmem:[%s784_s4 + $0x10] sm:$0xff] %v435_v9  ;;  %459 = vst [vmem:[%s784_s4 + $0x50] sm:$0xff] %v443_v10  ;;  %v433_v13 = vsel %vm401_vm2, %v385_v1, %v417_v7  ;;  %v441_v14 = vsel %vm409_vm3, %v393_v2, %v425_v8  ;;  %v386_v15 = vadd.f32 %v370_v37, %v338_v3  ;;  %v524_v17 = vpop.f32.mrb[4].mxu0  ;;  %v532_v18 = vpop.f32.mrb[4].mxu1 }
  0xfe   :  { %v394_v16 = vadd.f32 %v378_v38, %v346_v4  ;;  %449 = vst [vmem:[%s784_s4] sm:$0xff] %v433_v13  ;;  %457 = vst [vmem:[%s784_s4 + $0x40] sm:$0xff] %v441_v14  ;;  %vm404_vm4 = vcmp.ge.f32.partialorder %v388_v11, 0.0  ;;  %v420_v19 = vmul.f32 0.01, %v388_v11  ;;  %vm412_vm5 = vcmp.ge.f32.partialorder %v396_v12, 0.0  ;;  %v232_v28 = vpop.f32.mrb[5].mxu0 }
  0xff   :  { %v428_v20 = vmul.f32 0.01, %v396_v12  ;;  %vm402_vm6 = vcmp.ge.f32.partialorder %v386_v15, 0.0  ;;  %v418_v21 = vmul.f32 0.01, %v386_v15  ;;  %v343_v26 = vadd.f32 %v524_v17, %v660_v22  ;;  %v264_v29 = vpop.f32.mrb[5].mxu1 }
 0x100   :  { %vm410_vm7 = vcmp.ge.f32.partialorder %v394_v16, 0.0  ;;  %v426_v23 = vmul.f32 0.01, %v394_v16  ;;  %v436_v24 = vsel %vm404_vm4, %v388_v11, %v420_v19  ;;  %v351_v27 = vadd.f32 %v532_v18, %v660_v22  ;;  %v525_v34 = vpop.f32.mrb[6].mxu0  ;;  %v533_v35 = vpop.f32.mrb[6].mxu1 }
 0x101   :  { %v444_v25 = vsel %vm412_vm5, %v396_v12, %v428_v20  ;;  %452 = vst [vmem:[%s784_s4 + $0x18] sm:$0xff] %v436_v24  ;;  %v434_v30 = vsel %vm402_vm6, %v386_v15, %v418_v21  ;;  %v341_v32 = vadd.f32 %v660_v22, %v232_v28  ;;  %v349_v33 = vadd.f32 %v660_v22, %v264_v29  ;;  %v235_v40 = vpop.f32.mrb[7].mxu0  ;;  %v267_v41 = vpop.f32.mrb[7].mxu1 }
 0x102   :  { %460 = vst [vmem:[%s784_s4 + $0x58] sm:$0xff] %v444_v25  ;;  %v442_v31 = vsel %vm410_vm7, %v394_v16, %v426_v23  ;;  %450 = vst [vmem:[%s784_s4 + $0x8] sm:$0xff] %v434_v30  ;;  %v391_v36 = vadd.f32 %v692_v43, %v343_v26  ;;  %v399_v37 = vadd.f32 %v694_v44, %v351_v27 }
 0x103   :  { %458 = vst [vmem:[%s784_s4 + $0x48] sm:$0xff] %v442_v31  ;;  %v344_v38 = vadd.f32 %v525_v34, %v660_v22  ;;  %v352_v39 = vadd.f32 %v533_v35, %v660_v22  ;;  %v389_v42 = vadd.f32 %v696_v45, %v341_v32  ;;  %v397_v47 = vadd.f32 %v698_v46, %v349_v33 }
 0x104   :  { %v342_v48 = vadd.f32 %v660_v22, %v235_v40  ;;  %v350_v49 = vadd.f32 %v660_v22, %v267_v41  ;;  %vm407_vm8 = vcmp.ge.f32.partialorder %v391_v36, 0.0  ;;  %v423_v50 = vmul.f32 0.01, %v391_v36 }
 0x105   :  { %vm415_vm9 = vcmp.ge.f32.partialorder %v399_v37, 0.0  ;;  %v431_v43 = vmul.f32 0.01, %v399_v37  ;;  %vm405_vm10 = vcmp.ge.f32.partialorder %v389_v42, 0.0  ;;  %v421_v44 = vmul.f32 0.01, %v389_v42 }
 0x106   :  { %vm413_vm11 = vcmp.ge.f32.partialorder %v397_v47, 0.0  ;;  %v429_v53 = vmul.f32 0.01, %v397_v47  ;;  %v439_v54 = vsel %vm407_vm8, %v391_v36, %v423_v50  ;;  %v392_v56 = vadd.f32 %v702_v51, %v344_v38 }
 0x107   :  { %v447_v55 = vsel %vm415_vm9, %v399_v37, %v431_v43  ;;  %v400_v45 = vadd.f32 %v704_v52, %v352_v39  ;;  %455 = vst [vmem:[%s784_s4 + $0x30] sm:$0xff] %v439_v54  ;;  %v437_v22 = vsel %vm405_vm10, %v389_v42, %v421_v44  ;;  %v390_v59 = vadd.f32 %v708_v57, %v342_v48 }
 0x108   :  { %463 = vst [vmem:[%s784_s4 + $0x70] sm:$0xff] %v447_v55  ;;  %v445_v46 = vsel %vm413_vm11, %v397_v47, %v429_v53  ;;  %v398_v60 = vadd.f32 %v710_v58, %v350_v49  ;;  %453 = vst [vmem:[%s784_s4 + $0x20] sm:$0xff] %v437_v22  ;;  %vm408_vm12 = vcmp.ge.f32.partialorder %v392_v56, 0.0  ;;  %v424_v51 = vmul.f32 0.01, %v392_v56 }
 0x109   :  { %461 = vst [vmem:[%s784_s4 + $0x60] sm:$0xff] %v445_v46  ;;  %vm416_vm13 = vcmp.ge.f32.partialorder %v400_v45, 0.0  ;;  %v432_v52 = vmul.f32 0.01, %v400_v45  ;;  %vm406_vm14 = vcmp.ge.f32.partialorder %v390_v59, 0.0 }
 0x10a   :  { %v422_v61 = vmul.f32 0.01, %v390_v59  ;;  %vm414_vm15 = vcmp.ge.f32.partialorder %v398_v60, 0.0  ;;  %v430_v62 = vmul.f32 0.01, %v398_v60  ;;  %v440_v63 = vsel %vm408_vm12, %v392_v56, %v424_v51 }
 0x10b   :  { %v448_v57 = vsel %vm416_vm13, %v400_v45, %v432_v52  ;;  %456 = vst [vmem:[%s784_s4 + $0x38] sm:$0xff] %v440_v63 }
 0x10c   :  { %464 = vst [vmem:[%s784_s4 + $0x78] sm:$0xff] %v448_v57  ;;  %v438_v58 = vsel %vm406_vm14, %v390_v59, %v422_v61  ;;  %v446_v0 = vsel %vm414_vm15, %v398_v60, %v430_v62 }
 0x10d   :  { %454 = vst [vmem:[%s784_s4 + $0x28] sm:$0xff] %v438_v58  ;;  %462 = vst [vmem:[%s784_s4 + $0x68] sm:$0xff] %v446_v0 }

// kernel: model_forward.7
= control target key start
LH: loop header
LB: loop body
LE: loop exit
PB: predicated region body
PF: predicated region fallthrough
CT: control target
= control target key end

     0   :  { %s1317_s1 = inlined_call_operand.vmem [shape: bf16[384,128], index: 1, kind: input, shape index: {}]   ;;  %s1318_s0 = inlined_call_operand.vmem [shape: bf16[128,384], index: 0, kind: input, shape index: {}]   ;;  %s1319_s2 = inlined_call_operand.vmem [shape: f32[128,128], index: 2, kind: input, shape index: {}]   ;;  %s1320_s3 = inlined_call_operand.vmem [shape: f32[1,128], index: 3, kind: input, shape index: {}]   ;;  %s1321_s4 = inlined_call_operand.vmem [shape: f32[128,128], index: 4, kind: output, shape index: {}]  }
   0x1   :  { %v951_v0 = vld [vmem:[%s1317_s1 + $0x40] sm:$0xff]   ;;  %v954_v3 = vld [vmem:[%s1317_s1 + $0x48] sm:$0xff]   ;;  %v957_v6 = vld [vmem:[%s1317_s1 + $0x50] sm:$0xff]  }
   0x2   :  { %v952_v1 = vld [vmem:[%s1317_s1] sm:$0xff]   ;;  %839 = vmatprep.subr.bf16.mxu0 %v951_v0  ;;  %v955_v4 = vld [vmem:[%s1317_s1 + $0x8] sm:$0xff]   ;;  %v958_v7 = vld [vmem:[%s1317_s1 + $0x10] sm:$0xff]  }
   0x3   :  { %v953_v2 = vld [vmem:[%s1317_s1 + $0x80] sm:$0xff]   ;;  %840 = vmatpush3.bf16.msra.mxu0 %v952_v1  ;;  %v956_v5 = vld [vmem:[%s1317_s1 + $0x88] sm:$0xff]   ;;  %v959_v8 = vld [vmem:[%s1317_s1 + $0x90] sm:$0xff]  }
   0x4   :  { %919 = vmatprep.subr.bf16.mxu1 %v953_v2  ;;  %841 = vmatprep.subr.bf16.mxu0 %v954_v3  ;;  %v960_v9 = vld [vmem:[%s1317_s1 + $0x58] sm:$0xff]   ;;  %v963_v12 = vld [vmem:[%s1317_s1 + $0x60] sm:$0xff]   ;;  %v966_v15 = vld [vmem:[%s1317_s1 + $0x68] sm:$0xff]  }
   0x5   :  { %920 = vmatpush3.bf16.msra.mxu1 %v953_v2  ;;  %v961_v10 = vld [vmem:[%s1317_s1 + $0x18] sm:$0xff]   ;;  %v965_v13 = vld [vmem:[%s1317_s1 + $0xa0] sm:$0xff]   ;;  %v968_v16 = vld [vmem:[%s1317_s1 + $0xa8] sm:$0xff]  }
   0x6   :  { %921 = vmatprep.subr.bf16.mxu1 %v956_v5  ;;  %v962_v11 = vld [vmem:[%s1317_s1 + $0x98] sm:$0xff]   ;;  %v964_v14 = vld [vmem:[%s1317_s1 + $0x20] sm:$0xff]   ;;  %v967_v17 = vld [vmem:[%s1317_s1 + $0x28] sm:$0xff]  }
   0x7   :  { %842 = vmatpush3.bf16.msra.mxu0 %v955_v4  ;;  %v969_v18 = vld [vmem:[%s1317_s1 + $0x70] sm:$0xff]   ;;  %v972_v21 = vld [vmem:[%s1317_s1 + $0x78] sm:$0xff]   ;;  %v975_v26 = vld [vmem:[%s1318_s0] ss:$12 sps:$4 sm:$0xff]  }
   0x8   :  { %843 = vmatprep.subr.bf16.mxu0 %v957_v6  ;;  %v970_v19 = vld [vmem:[%s1317_s1 + $0x30] sm:$0xff]   ;;  %v974_v22 = vld [vmem:[%s1317_s1 + $0xb8] sm:$0xff]   ;;  %v979_v28 = vld [vmem:[%s1318_s0 + $0x20] ss:$12 sps:$4 sm:$0xff]  }
   0x9   :  { %922 = vmatpush3.bf16.msra.mxu1 %v956_v5  ;;  %v971_v20 = vld [vmem:[%s1317_s1 + $0xb0] sm:$0xff]   ;;  %v973_v25 = vld [vmem:[%s1317_s1 + $0x38] sm:$0xff]   ;;  %v995_v36 = vld [vmem:[%s1318_s0 + $0x80] ss:$12 sps:$4 sm:$0xff]  }
   0xa   :  { %923 = vmatprep.subr.bf16.mxu1 %v959_v8  ;;  %v977_v23 = vld [vmem:[%s1318_s0 + $0x4] ss:$12 sps:$4 sm:$0xff]   ;;  %v978_v24 = vld [vmem:[%s1318_s0 + $0x8] ss:$12 sps:$4 sm:$0xff]   ;;  %v988_v35 = vld [vmem:[%s1318_s0 + $0x4c] ss:$12 sps:$4 sm:$0xff]  }
   0xb   :  { %844 = vmatpush3.bf16.msra.mxu0 %v958_v7  ;;  %438 = vmatprep.mubr.bf16.mxu0 %v977_v23  ;;  %v980_v27 = vld [vmem:[%s1318_s0 + $0x1c] ss:$12 sps:$4 sm:$0xff]   ;;  %v986_v29 = vld [vmem:[%s1318_s0 + $0x38] ss:$12 sps:$4 sm:$0xff]   ;;  %v983_v31 = vld [vmem:[%s1318_s0 + $0x34] ss:$12 sps:$4 sm:$0xff]  }
   0xc   :  { %845 = vmatprep.subr.bf16.mxu0 %v960_v9  ;;  %935 = vmatprep.mubr.bf16.mxu1 %v978_v24  ;;  %v982_v30 = vld [vmem:[%s1318_s0 + $0x18] ss:$12 sps:$4 sm:$0xff]   ;;  %v987_v32 = vld [vmem:[%s1318_s0 + $0x50] ss:$12 sps:$4 sm:$0xff]   ;;  %v994_v33 = vld [vmem:[%s1318_s0 + $0x68] ss:$12 sps:$4 sm:$0xff]  }
   0xd   :  { %924 = vmatpush3.bf16.msra.mxu1 %v959_v8  ;;  %v985_v34 = vld [vmem:[%s1318_s0 + $0x30] ss:$12 sps:$4 sm:$0xff]   ;;  %v1002_v37 = vld [vmem:[%s1318_s0 + $0x98] ss:$12 sps:$4 sm:$0xff]   ;;  %v990_v38 = vld [vmem:[%s1318_s0 + $0x48] ss:$12 sps:$4 sm:$0xff]  }
   0xe   :  { %925 = vmatprep.subr.bf16.mxu1 %v962_v11  ;;  %v991_v39 = vld [vmem:[%s1318_s0 + $0x64] ss:$12 sps:$4 sm:$0xff]   ;;  %v993_v41 = vld [vmem:[%s1318_s0 + $0x60] ss:$12 sps:$4 sm:$0xff]   ;;  %v996_v42 = vld [vmem:[%s1318_s0 + $0x7c] ss:$12 sps:$4 sm:$0xff]  }
   0xf   :  { %846 = vmatpush3.bf16.msra.mxu0 %v961_v10  ;;  %v1003_v40 = vld [vmem:[%s1318_s0 + $0xb0] ss:$12 sps:$4 sm:$0xff]   ;;  %v998_v43 = vld [vmem:[%s1318_s0 + $0x78] ss:$12 sps:$4 sm:$0xff]   ;;  %v999_v44 = vld [vmem:[%s1318_s0 + $0x94] ss:$12 sps:$4 sm:$0xff]  }
  0x10   :  { %847 = vmatprep.subr.bf16.mxu0 %v963_v12  ;;  %v1001_v45 = vld [vmem:[%s1318_s0 + $0x90] ss:$12 sps:$4 sm:$0xff]   ;;  %v1004_v46 = vld [vmem:[%s1318_s0 + $0xac] ss:$12 sps:$4 sm:$0xff]   ;;  %v1006_v47 = vld [vmem:[%s1318_s0 + $0xa8] ss:$12 sps:$4 sm:$0xff]  }
  0x11   :  { %926 = vmatpush3.bf16.msra.mxu1 %v962_v11  ;;  %v674_v50 = vld [vmem:[%s1319_s2] sm:$0xff]  ;;  %v675_v57 = vld [vmem:[%s1319_s2 + $0x8] sm:$0xff]  ;;  %v676_v5 = vld [vmem:[%s1319_s2 + $0x10] sm:$0xff] }
  0x12   :  { %927 = vmatprep.subr.bf16.mxu1 %v965_v13  ;;  %v1182_v56 = vld [vmem:[%s1320_s3] ss:$0 sm:$0xff]  ;;  %v690_v60 = vmul.f32 0.5, %v674_v50  ;;  %v691_v1 = vmul.f32 0.5, %v675_v57  ;;  %v692_v12 = vmul.f32 0.5, %v676_v5 }
  0x13   :  { %848 = vmatpush3.bf16.msra.mxu0 %v964_v14 }
  0x14   :  { %849 = vmatprep.subr.bf16.mxu0 %v966_v15 }
  0x15   :  { %928 = vmatpush3.bf16.msra.mxu1 %v965_v13 }
  0x16   :  { %929 = vmatprep.subr.bf16.mxu1 %v968_v16 }
  0x17   :  { %850 = vmatpush3.bf16.msra.mxu0 %v967_v17 }
  0x18   :  { %851 = vmatprep.subr.bf16.mxu0 %v969_v18  ;;  %v677_v18 = vld [vmem:[%s1319_s2 + $0x18] sm:$0xff] }
  0x19   :  { %930 = vmatpush3.bf16.msra.mxu1 %v968_v16 }
  0x1a   :  { %931 = vmatprep.subr.bf16.mxu1 %v971_v20 }
  0x1b   :  { %852 = vmatpush3.bf16.msra.mxu0 %v970_v19 }
  0x1c   :  { %853 = vmatprep.subr.bf16.mxu0 %v972_v21 }
  0x1d   :  { %932 = vmatpush3.bf16.msra.mxu1 %v971_v20 }
  0x1e   :  { %933 = vmatprep.subr.bf16.mxu1 %v974_v22 }
  0x1f   :  { %854 = vmatpush3.bf16.msra.mxu0 %v973_v25  ;;  %v693_v25 = vmul.f32 0.5, %v677_v18 }
  0x21   :  { %934 = vmatpush3.bf16.msra.mxu1 %v974_v22 }
  0x22   :  { %439 = vmatmul.mubr.bf16.vlgmr.msra.gmra.mrb[0].mxu0 %v975_v26 }
  0x23   :  { %446 = vmatprep.mubr.bf16.mxu0 %v980_v27 }
  0x24   :  { %936 = vmatmul.mubr.bf16.vlgmr.msra.gmra.mrb[0].mxu1 %v979_v28 }
  0x25   :  { %939 = vmatprep.mubr.bf16.mxu1 %v986_v29 }
  0x2a   :  { %447 = vmatmul.mubr.bf16.gmra.mrb[4].mxu0 %v982_v30  ;;  %v678_v30 = vld [vmem:[%s1319_s2 + $0x20] sm:$0xff] }
  0x2b   :  { %454 = vmatprep.mubr.bf16.mxu0 %v983_v31 }
  0x2c   :  { %940 = vmatmul.mubr.bf16.gmra.mrb[4].mxu1 %v987_v32 }
  0x2d   :  { %943 = vmatprep.mubr.bf16.mxu1 %v994_v33 }
  0x32   :  { %455 = vmatmul.mubr.bf16.gmra.mrb[8].mxu0 %v985_v34 }
  0x33   :  { %462 = vmatprep.mubr.bf16.mxu0 %v988_v35 }
  0x34   :  { %944 = vmatmul.mubr.bf16.gmra.mrb[8].mxu1 %v995_v36 }
  0x35   :  { %947 = vmatprep.mubr.bf16.mxu1 %v1002_v37  ;;  %v679_v37 = vld [vmem:[%s1319_s2 + $0x28] sm:$0xff] }
  0x3a   :  { %463 = vmatmul.mubr.bf16.gmra.mrb[12].mxu0 %v990_v38 }
  0x3b   :  { %470 = vmatprep.mubr.bf16.mxu0 %v991_v39 }
  0x3c   :  { %948 = vmatmul.mubr.bf16.gmra.mrb[12].mxu1 %v1003_v40 }
  0x42   :  { %471 = vmatmul.mubr.bf16.gmra.mrb[16].mxu0 %v993_v41 }
  0x43   :  { %478 = vmatprep.mubr.bf16.mxu0 %v996_v42  ;;  %v694_v42 = vmul.f32 0.5, %v678_v30 }
  0x4a   :  { %479 = vmatmul.mubr.bf16.gmra.mrb[20].mxu0 %v998_v43 }
  0x4b   :  { %486 = vmatprep.mubr.bf16.mxu0 %v999_v44 }
  0x52   :  { %487 = vmatmul.mubr.bf16.gmra.mrb[24].mxu0 %v1001_v45 }
  0x53   :  { %494 = vmatprep.mubr.bf16.mxu0 %v1004_v46 }
  0x5a   :  { %495 = vmatmul.mubr.bf16.gmra.mrb[28].mxu0 %v1006_v47 }
  0xf5   :  { %v855_v48 = vpop.f32.mrb[0].mxu0 }
  0xf6   :  { %v856_v49 = vpop.f32.mrb[1].mxu0 }
  0xf7   :  { %v857_v51 = vadd.f32 %v856_v49, %v855_v48  ;;  %v858_v52 = vpop.f32.mrb[2].mxu0  ;;  %v937_v53 = vpop.f32.mrb[0].mxu1  ;;  %v695_v48 = vmul.f32 0.5, %v679_v37 }
  0xf8   :  { %v859_v54 = vpop.f32.mrb[3].mxu0  ;;  %v537_v55 = vpop.f32.mrb[1].mxu1 }
  0xf9   :  { %v860_v58 = vadd.f32 %v859_v54, %v858_v52  ;;  %v538_v59 = vadd.f32 %v857_v51, %v537_v55  ;;  %v938_v61 = vpop.f32.mrb[2].mxu1 }
  0xfa   :  { %v540_v62 = vpop.f32.mrb[3].mxu1 }
  0xfb   :  { %v658_v63 = vadd.f32 %v1182_v56, %v538_v59  ;;  %v541_v0 = vadd.f32 %v860_v58, %v540_v62 }
  0xfd   :  { %v706_v2 = vadd.f32 %v690_v60, %v658_v63  ;;  %v659_v3 = vadd.f32 %v1182_v56, %v541_v0  ;;  %v861_v4 = vpop.f32.mrb[4].mxu0 }
  0xfe   :  { %v862_v6 = vpop.f32.mrb[5].mxu0 }
  0xff   :  { %vm722_vm0 = vcmp.ge.f32.partialorder %v706_v2, 0.0  ;;  %v738_v7 = vmul.f32 0.01, %v706_v2  ;;  %v707_v8 = vadd.f32 %v691_v1, %v659_v3  ;;  %v863_v9 = vadd.f32 %v862_v6, %v861_v4  ;;  %v864_v10 = vpop.f32.mrb[6].mxu0  ;;  %v1192_v11 = vpop.f32.mrb[4].mxu1  ;;  %v681_v3 = vld [vmem:[%s1319_s2 + $0x38] sm:$0xff] }
 0x100   :  { %v865_v13 = vpop.f32.mrb[7].mxu0  ;;  %v553_v14 = vpop.f32.mrb[5].mxu1 }
 0x101   :  { %v754_v15 = vsel %vm722_vm0, %v706_v2, %v738_v7  ;;  %vm723_vm1 = vcmp.ge.f32.partialorder %v707_v8, 0.0  ;;  %v739_v16 = vmul.f32 0.01, %v707_v8  ;;  %v546_v17 = vadd.f32 %v937_v53, %v863_v9  ;;  %v1197_v19 = vpop.f32.mrb[6].mxu1  ;;  %v680_v53 = vld [vmem:[%s1319_s2 + $0x30] sm:$0xff] }
 0x102   :  { %770 = vst [vmem:[%s1321_s4] sm:$0xff] %v754_v15  ;;  %v866_v20 = vadd.f32 %v865_v13, %v864_v10  ;;  %v556_v21 = vpop.f32.mrb[7].mxu1  ;;  %v697_v10 = vmul.f32 0.5, %v681_v3  ;;  %v682_v15 = vld [vmem:[%s1319_s2 + $0x40] sm:$0xff] }
 0x103   :  { %v755_v22 = vsel %vm723_vm1, %v707_v8, %v739_v16  ;;  %v660_v23 = vadd.f32 %v1182_v56, %v546_v17 }
 0x104   :  { %771 = vst [vmem:[%s1321_s4 + $0x8] sm:$0xff] %v755_v22  ;;  %v549_v24 = vadd.f32 %v938_v61, %v866_v20  ;;  %v696_v61 = vmul.f32 0.5, %v680_v53 }
 0x105   :  { %v708_v26 = vadd.f32 %v692_v12, %v660_v23  ;;  %v867_v27 = vpop.f32.mrb[8].mxu0 }
 0x106   :  { %v661_v28 = vadd.f32 %v1182_v56, %v549_v24  ;;  %v868_v29 = vpop.f32.mrb[9].mxu0 }
 0x107   :  { %vm724_vm2 = vcmp.ge.f32.partialorder %v708_v26, 0.0  ;;  %v740_v31 = vmul.f32 0.01, %v708_v26  ;;  %v869_v32 = vadd.f32 %v868_v29, %v867_v27  ;;  %v870_v33 = vpop.f32.mrb[10].mxu0  ;;  %v1210_v34 = vpop.f32.mrb[8].mxu1 }
 0x108   :  { %v709_v35 = vadd.f32 %v693_v25, %v661_v28  ;;  %v871_v36 = vpop.f32.mrb[11].mxu0  ;;  %v569_v38 = vpop.f32.mrb[9].mxu1  ;;  %v698_v25 = vmul.f32 0.5, %v682_v15 }
 0x109   :  { %v756_v39 = vsel %vm724_vm2, %v708_v26, %v740_v31  ;;  %v872_v40 = vadd.f32 %v871_v36, %v870_v33  ;;  %v554_v41 = vadd.f32 %v869_v32, %v553_v14  ;;  %v1215_v43 = vpop.f32.mrb[10].mxu1 }
 0x10a   :  { %772 = vst [vmem:[%s1321_s4 + $0x10] sm:$0xff] %v756_v39  ;;  %vm725_vm3 = vcmp.ge.f32.partialorder %v709_v35, 0.0  ;;  %v741_v44 = vmul.f32 0.01, %v709_v35  ;;  %v572_v45 = vpop.f32.mrb[11].mxu1 }
 0x10b   :  { %v662_v46 = vadd.f32 %v1182_v56, %v554_v41  ;;  %v557_v47 = vadd.f32 %v872_v40, %v556_v21 }
 0x10c   :  { %v757_v49 = vsel %vm725_vm3, %v709_v35, %v741_v44  ;;  %v684_v35 = vld [vmem:[%s1319_s2 + $0x50] sm:$0xff] }
 0x10d   :  { %773 = vst [vmem:[%s1321_s4 + $0x18] sm:$0xff] %v757_v49  ;;  %v710_v50 = vadd.f32 %v694_v42, %v662_v46  ;;  %v663_v51 = vadd.f32 %v1182_v56, %v557_v47  ;;  %v873_v52 = vpop.f32.mrb[12].mxu0  ;;  %v700_v41 = vmul.f32 0.5, %v684_v35  ;;  %v685_v47 = vld [vmem:[%s1319_s2 + $0x58] sm:$0xff] }
 0x10e   :  { %v874_v54 = vpop.f32.mrb[13].mxu0 }
 0x10f   :  { %vm726_vm4 = vcmp.ge.f32.partialorder %v710_v50, 0.0  ;;  %v742_v55 = vmul.f32 0.01, %v710_v50  ;;  %v711_v57 = vadd.f32 %v695_v48, %v663_v51  ;;  %v875_v58 = vadd.f32 %v874_v54, %v873_v52  ;;  %v876_v59 = vpop.f32.mrb[14].mxu0  ;;  %v1228_v60 = vpop.f32.mrb[12].mxu1 }
 0x110   :  { %v877_v62 = vpop.f32.mrb[15].mxu0  ;;  %v1230_v63 = vpop.f32.mrb[13].mxu1  ;;  %v701_v52 = vmul.f32 0.5, %v685_v47 }
 0x111   :  { %v758_v0 = vsel %vm726_vm4, %v710_v50, %v742_v55  ;;  %vm727_vm5 = vcmp.ge.f32.partialorder %v711_v57, 0.0  ;;  %v743_v1 = vmul.f32 0.01, %v711_v57  ;;  %v562_v2 = vadd.f32 %v1192_v11, %v875_v58  ;;  %v1236_v4 = vpop.f32.mrb[14].mxu1 }
 0x112   :  { %774 = vst [vmem:[%s1321_s4 + $0x20] sm:$0xff] %v758_v0  ;;  %v878_v5 = vadd.f32 %v877_v62, %v876_v59  ;;  %v1241_v6 = vpop.f32.mrb[15].mxu1 }
 0x113   :  { %v759_v7 = vsel %vm727_vm5, %v711_v57, %v743_v1  ;;  %v664_v8 = vadd.f32 %v1182_v56, %v562_v2  ;;  %v686_v57 = vld [vmem:[%s1319_s2 + $0x60] sm:$0xff] }
 0x114   :  { %775 = vst [vmem:[%s1321_s4 + $0x28] sm:$0xff] %v759_v7  ;;  %v565_v9 = vadd.f32 %v1197_v19, %v878_v5  ;;  %v683_v19 = vld [vmem:[%s1319_s2 + $0x48] sm:$0xff]  ;;  %v702_v5 = vmul.f32 0.5, %v686_v57 }
 0x115   :  { %v712_v11 = vadd.f32 %v696_v61, %v664_v8  ;;  %v879_v12 = vpop.f32.mrb[16].mxu0  ;;  %v699_v29 = vmul.f32 0.5, %v683_v19 }
 0x116   :  { %v665_v13 = vadd.f32 %v1182_v56, %v565_v9  ;;  %v880_v14 = vpop.f32.mrb[17].mxu0 }
 0x117   :  { %vm728_vm6 = vcmp.ge.f32.partialorder %v712_v11, 0.0  ;;  %v744_v16 = vmul.f32 0.01, %v712_v11  ;;  %v881_v17 = vadd.f32 %v880_v14, %v879_v12  ;;  %v882_v18 = vpop.f32.mrb[18].mxu0  ;;  %v688_v14 = vld [vmem:[%s1319_s2 + $0x70] sm:$0xff] }
 0x118   :  { %v713_v20 = vadd.f32 %v697_v10, %v665_v13  ;;  %v883_v21 = vpop.f32.mrb[19].mxu0 }
 0x119   :  { %v760_v22 = vsel %vm728_vm6, %v712_v11, %v744_v16  ;;  %v884_v23 = vadd.f32 %v883_v21, %v882_v18  ;;  %v570_v24 = vadd.f32 %v881_v17, %v569_v38 }
 0x11a   :  { %776 = vst [vmem:[%s1321_s4 + $0x30] sm:$0xff] %v760_v22  ;;  %vm729_vm7 = vcmp.ge.f32.partialorder %v713_v20, 0.0  ;;  %v745_v26 = vmul.f32 0.01, %v713_v20 }
 0x11b   :  { %v666_v27 = vadd.f32 %v1182_v56, %v570_v24  ;;  %v573_v28 = vadd.f32 %v884_v23, %v572_v45  ;;  %v689_v24 = vld [vmem:[%s1319_s2 + $0x78] sm:$0xff] }
 0x11c   :  { %v761_v30 = vsel %vm729_vm7, %v713_v20, %v745_v26  ;;  %v704_v20 = vmul.f32 0.5, %v688_v14 }
 0x11d   :  { %777 = vst [vmem:[%s1321_s4 + $0x38] sm:$0xff] %v761_v30  ;;  %v714_v31 = vadd.f32 %v698_v25, %v666_v27  ;;  %v667_v32 = vadd.f32 %v1182_v56, %v573_v28  ;;  %v885_v33 = vpop.f32.mrb[20].mxu0 }
 0x11e   :  { %v886_v36 = vpop.f32.mrb[21].mxu0 }
 0x11f   :  { %vm730_vm8 = vcmp.ge.f32.partialorder %v714_v31, 0.0  ;;  %v746_v37 = vmul.f32 0.01, %v714_v31  ;;  %v715_v38 = vadd.f32 %v699_v29, %v667_v32  ;;  %v887_v39 = vadd.f32 %v886_v36, %v885_v33  ;;  %v888_v40 = vpop.f32.mrb[22].mxu0 }
 0x120   :  { %v889_v42 = vpop.f32.mrb[23].mxu0  ;;  %v705_v29 = vmul.f32 0.5, %v689_v24 }
 0x121   :  { %v762_v44 = vsel %vm730_vm8, %v714_v31, %v746_v37  ;;  %vm731_vm9 = vcmp.ge.f32.partialorder %v715_v38, 0.0  ;;  %v747_v45 = vmul.f32 0.01, %v715_v38  ;;  %v578_v46 = vadd.f32 %v1210_v34, %v887_v39 }
 0x122   :  { %778 = vst [vmem:[%s1321_s4 + $0x40] sm:$0xff] %v762_v44  ;;  %v890_v48 = vadd.f32 %v889_v42, %v888_v40 }
 0x123   :  { %v763_v49 = vsel %vm731_vm9, %v715_v38, %v747_v45  ;;  %v668_v50 = vadd.f32 %v1182_v56, %v578_v46 }
 0x124   :  { %779 = vst [vmem:[%s1321_s4 + $0x48] sm:$0xff] %v763_v49  ;;  %v581_v51 = vadd.f32 %v1215_v43, %v890_v48  ;;  %v687_v43 = vld [vmem:[%s1319_s2 + $0x68] sm:$0xff] }
 0x125   :  { %v716_v34 = vadd.f32 %v700_v41, %v668_v50  ;;  %v891_v53 = vpop.f32.mrb[24].mxu0  ;;  %v703_v10 = vmul.f32 0.5, %v687_v43 }
 0x126   :  { %v669_v54 = vadd.f32 %v1182_v56, %v581_v51  ;;  %v892_v55 = vpop.f32.mrb[25].mxu0 }
 0x127   :  { %vm732_vm10 = vcmp.ge.f32.partialorder %v716_v34, 0.0  ;;  %v748_v58 = vmul.f32 0.01, %v716_v34  ;;  %v893_v59 = vadd.f32 %v892_v55, %v891_v53  ;;  %v894_v61 = vpop.f32.mrb[26].mxu0 }
 0x128   :  { %v717_v62 = vadd.f32 %v701_v52, %v669_v54  ;;  %v895_v0 = vpop.f32.mrb[27].mxu0 }
 0x129   :  { %v764_v1 = vsel %vm732_vm10, %v716_v34, %v748_v58  ;;  %v896_v2 = vadd.f32 %v895_v0, %v894_v61  ;;  %v586_v3 = vadd.f32 %v893_v59, %v1230_v63 }
 0x12a   :  { %780 = vst [vmem:[%s1321_s4 + $0x50] sm:$0xff] %v764_v1  ;;  %vm733_vm11 = vcmp.ge.f32.partialorder %v717_v62, 0.0  ;;  %v749_v7 = vmul.f32 0.01, %v717_v62 }
 0x12b   :  { %v670_v8 = vadd.f32 %v1182_v56, %v586_v3  ;;  %v589_v9 = vadd.f32 %v896_v2, %v1241_v6 }
 0x12c   :  { %v765_v11 = vsel %vm733_vm11, %v717_v62, %v749_v7 }
 0x12d   :  { %781 = vst [vmem:[%s1321_s4 + $0x58] sm:$0xff] %v765_v11  ;;  %v718_v12 = vadd.f32 %v702_v5, %v670_v8  ;;  %v671_v63 = vadd.f32 %v1182_v56, %v589_v9  ;;  %v897_v13 = vpop.f32.mrb[28].mxu0 }
 0x12e   :  { %v898_v15 = vpop.f32.mrb[29].mxu0 }
 0x12f   :  { %vm734_vm12 = vcmp.ge.f32.partialorder %v718_v12, 0.0  ;;  %v750_v16 = vmul.f32 0.01, %v718_v12  ;;  %v719_v17 = vadd.f32 %v703_v10, %v671_v63  ;;  %v899_v18 = vadd.f32 %v898_v15, %v897_v13  ;;  %v900_v6 = vpop.f32.mrb[30].mxu0 }
 0x130   :  { %v901_v21 = vpop.f32.mrb[31].mxu0 }
 0x131   :  { %v766_v19 = vsel %vm734_vm12, %v718_v12, %v750_v16  ;;  %vm735_vm13 = vcmp.ge.f32.partialorder %v719_v17, 0.0  ;;  %v751_v22 = vmul.f32 0.01, %v719_v17  ;;  %v594_v23 = vadd.f32 %v1228_v60, %v899_v18 }
 0x132   :  { %782 = vst [vmem:[%s1321_s4 + $0x60] sm:$0xff] %v766_v19  ;;  %v902_v25 = vadd.f32 %v901_v21, %v900_v6 }
 0x133   :  { %v767_v26 = vsel %vm735_vm13, %v719_v17, %v751_v22  ;;  %v672_v27 = vadd.f32 %v1182_v56, %v594_v23 }
 0x134   :  { %783 = vst [vmem:[%s1321_s4 + $0x68] sm:$0xff] %v767_v26  ;;  %v597_v28 = vadd.f32 %v1236_v4, %v902_v25 }
 0x135   :  { %v720_v60 = vadd.f32 %v704_v20, %v672_v27 }
 0x136   :  { %v673_v30 = vadd.f32 %v1182_v56, %v597_v28 }
 0x137   :  { %vm736_vm14 = vcmp.ge.f32.partialorder %v720_v60, 0.0  ;;  %v752_v31 = vmul.f32 0.01, %v720_v60 }
 0x138   :  { %v721_v32 = vadd.f32 %v705_v29, %v673_v30 }
 0x139   :  { %v768_v33 = vsel %vm736_vm14, %v720_v60, %v752_v31 }
 0x13a   :  { %784 = vst [vmem:[%s1321_s4 + $0x70] sm:$0xff] %v768_v33  ;;  %vm737_vm15 = vcmp.ge.f32.partialorder %v721_v32, 0.0  ;;  %v753_v35 = vmul.f32 0.01, %v721_v32 }
 0x13c   :  { %v769_v36 = vsel %vm737_vm15, %v721_v32, %v753_v35 }
 0x13d   :  { %785 = vst [vmem:[%s1321_s4 + $0x78] sm:$0xff] %v769_v36 }

// kernel: model_forward.6
= control target key start
LH: loop header
LB: loop body
LE: loop exit
PB: predicated region body
PF: predicated region fallthrough
CT: control target
= control target key end

     0   :  { %20 = vsyncpa [#allocation3], 0  ;;  %s3248_s0 = inlined_call_operand.vmem [shape: f32[128,128], index: 0, kind: input, shape index: {}]   ;;  %s3249_s1 = inlined_call_operand.vmem [shape: f32[128,128], index: 1, kind: input, shape index: {}]   ;;  %s3250_s2 = inlined_call_operand.vmem [shape: f32[128,128], index: 2, kind: input, shape index: {}]   ;;  %s3251_s3 = inlined_call_operand.vmem [shape: bf16[128,128], index: 3, kind: input, shape index: {}]   ;;  %s3252_s4 = inlined_call_operand.vmem [shape: f32[1,128], index: 4, kind: input, shape index: {}]   ;;  %s3253_s5 = inlined_call_operand.vmem [shape: bf16[128,128], index: 5, kind: input, shape index: {}]   ;;  %s3254_s6 = inlined_call_operand.vmem [shape: f32[1,128], index: 6, kind: input, shape index: {}]   ;;  %s3255_s7 = inlined_call_operand.vmem [shape: bf16[128,128], index: 7, kind: input, shape index: {}]   ;;  %s3256_s8 = inlined_call_operand.vmem [shape: bf16[128,128], index: 8, kind: input, shape index: {}]   ;;  %s3257_s9 = inlined_call_operand.vmem [shape: bf16[128,384], index: 9, kind: input, shape index: {}]   ;;  %s3258_s10 = inlined_call_operand.vmem [shape: f32[128,128], index: 10, kind: output, shape index: {0}]   ;;  %s3259_s11 = inlined_call_operand.hbm [shape: f32[128,128], index: 11, kind: output, shape index: {1}]   ;;  %s3260_s12 = inlined_call_operand.vmem [shape: bf16[384,128], index: 12, kind: output, shape index: {2}]   ;;  %s3261_s13 = inlined_call_operand.vmem [shape: bf16[128,128], index: 13, kind: output, shape index: {3}]   ;;  %s3262_s14 = inlined_call_operand.hbm [shape: bf16[128,128], index: 14, kind: output, shape index: {4}]  }
   0x1   :  { %v2433_v0 = vld [vmem:[%s3251_s3] sm:$0xff]   ;;  %v2434_v1 = vld [vmem:[%s3251_s3 + $0x8] sm:$0xff]   ;;  %v2435_v2 = vld [vmem:[%s3251_s3 + $0x10] sm:$0xff]  }
   0x2   :  { %2266 = vmatprep.subr.bf16.mxu0 %v2433_v0  ;;  %v2440_v3 = vld [vmem:[%s3253_s5] sm:$0xff]   ;;  %v2436_v4 = vld [vmem:[%s3251_s3 + $0x18] sm:$0xff]   ;;  %v2442_v5 = vld [vmem:[%s3253_s5 + $0x8] sm:$0xff]  }
   0x3   :  { %2267 = vmatpush3.bf16.msra.mxu0 %v2433_v0  ;;  %2298 = vmatprep.subr.bf16.mxu1 %v2440_v3  ;;  %v43_v6 = vld [vmem:[%s3248_s0] sm:$0xff]  ;;  %v44_v7 = vld [vmem:[%s3248_s0 + $0x8] sm:$0xff]  ;;  %v2443_v10 = vld [vmem:[%s3253_s5 + $0x10] sm:$0xff]  }
   0x4   :  { %2268 = vmatprep.subr.bf16.mxu0 %v2434_v1  ;;  %2299 = vmatpush3.bf16.msra.mxu1 %v2440_v3  ;;  %v2437_v8 = vld [vmem:[%s3251_s3 + $0x20] sm:$0xff]   ;;  %v59_v9 = vpack.c.bf16 %v44_v7, %v43_v6  ;;  %v2444_v11 = vld [vmem:[%s3253_s5 + $0x18] sm:$0xff]   ;;  %v2438_v12 = vld [vmem:[%s3251_s3 + $0x28] sm:$0xff]  }
   0x5   :  { %2300 = vmatprep.subr.bf16.mxu1 %v2442_v5  ;;  %v2445_v13 = vld [vmem:[%s3253_s5 + $0x20] sm:$0xff]   ;;  %v2439_v14 = vld [vmem:[%s3251_s3 + $0x30] sm:$0xff]   ;;  %v284_v16 = vld [vmem:[%s3249_s1 + $0x8] sm:$0xff] }
   0x6   :  { %2282 = vmatprep.mubr.bf16.mxu0 %v59_v9  ;;  %v283_v15 = vld [vmem:[%s3249_s1] sm:$0xff]  ;;  %v2446_v18 = vld [vmem:[%s3253_s5 + $0x28] sm:$0xff]   ;;  %v2441_v19 = vld [vmem:[%s3251_s3 + $0x38] sm:$0xff]  }
   0x7   :  { %2269 = vmatpush3.bf16.msra.mxu0 %v2434_v1  ;;  %v299_v17 = vpack.c.bf16 %v284_v16, %v283_v15  ;;  %v45_v20 = vld [vmem:[%s3248_s0 + $0x10] sm:$0xff]  ;;  %v46_v21 = vld [vmem:[%s3248_s0 + $0x18] sm:$0xff]  ;;  %v47_v22 = vld [vmem:[%s3248_s0 + $0x20] sm:$0xff] }
   0x8   :  { %2270 = vmatprep.subr.bf16.mxu0 %v2435_v2  ;;  %2301 = vmatpush3.bf16.msra.mxu1 %v2442_v5  ;;  %v48_v23 = vld [vmem:[%s3248_s0 + $0x28] sm:$0xff]  ;;  %v2447_v24 = vld [vmem:[%s3253_s5 + $0x30] sm:$0xff]   ;;  %v2449_v25 = vld [vmem:[%s3255_s7] sm:$0xff]   ;;  %v60_v26 = vpack.c.bf16 %v46_v21, %v45_v20 }
   0x9   :  { %2302 = vmatprep.subr.bf16.mxu1 %v2443_v10  ;;  %2314 = vmatprep.mubr.bf16.mxu1 %v299_v17  ;;  %v61_v27 = vpack.c.bf16 %v48_v23, %v47_v22  ;;  %v2448_v28 = vld [vmem:[%s3253_s5 + $0x38] sm:$0xff]   ;;  %v285_v29 = vld [vmem:[%s3249_s1 + $0x10] sm:$0xff]  ;;  %v2450_v31 = vld [vmem:[%s3255_s7 + $0x8] sm:$0xff]  }
   0xa   :  { %v286_v30 = vld [vmem:[%s3249_s1 + $0x18] sm:$0xff]  ;;  %v49_v32 = vld [vmem:[%s3248_s0 + $0x30] sm:$0xff]  ;;  %v287_v34 = vld [vmem:[%s3249_s1 + $0x20] sm:$0xff] }
   0xb   :  { %2271 = vmatpush3.bf16.msra.mxu0 %v2435_v2  ;;  %v50_v33 = vld [vmem:[%s3248_s0 + $0x38] sm:$0xff]  ;;  %v288_v35 = vld [vmem:[%s3249_s1 + $0x28] sm:$0xff]  ;;  %v51_v36 = vld [vmem:[%s3248_s0 + $0x40] sm:$0xff]  ;;  %v300_v39 = vpack.c.bf16 %v286_v30, %v285_v29 }
   0xc   :  { %2272 = vmatprep.subr.bf16.mxu0 %v2436_v4  ;;  %2303 = vmatpush3.bf16.msra.mxu1 %v2443_v10  ;;  %v52_v37 = vld [vmem:[%s3248_s0 + $0x48] sm:$0xff]  ;;  %v2451_v38 = vld [vmem:[%s3255_s7 + $0x10] sm:$0xff]   ;;  %v62_v40 = vpack.c.bf16 %v50_v33, %v49_v32  ;;  %v301_v41 = vpack.c.bf16 %v288_v35, %v287_v34  ;;  %v2452_v43 = vld [vmem:[%s3255_s7 + $0x18] sm:$0xff]  }
   0xd   :  { %2304 = vmatprep.subr.bf16.mxu1 %v2444_v11  ;;  %v63_v42 = vpack.c.bf16 %v52_v37, %v51_v36  ;;  %v289_v44 = vld [vmem:[%s3249_s1 + $0x30] sm:$0xff]  ;;  %v290_v45 = vld [vmem:[%s3249_s1 + $0x38] sm:$0xff]  ;;  %v291_v48 = vld [vmem:[%s3249_s1 + $0x40] sm:$0xff] }
   0xe   :  { %v53_v46 = vld [vmem:[%s3248_s0 + $0x50] sm:$0xff]  ;;  %v54_v47 = vld [vmem:[%s3248_s0 + $0x58] sm:$0xff]  ;;  %v292_v49 = vld [vmem:[%s3249_s1 + $0x48] sm:$0xff]  ;;  %v302_v53 = vpack.c.bf16 %v290_v45, %v289_v44 }
   0xf   :  { %2273 = vmatpush3.bf16.msra.mxu0 %v2436_v4  ;;  %v55_v50 = vld [vmem:[%s3248_s0 + $0x60] sm:$0xff]  ;;  %v56_v51 = vld [vmem:[%s3248_s0 + $0x68] sm:$0xff]  ;;  %v64_v54 = vpack.c.bf16 %v54_v47, %v53_v46  ;;  %v303_v55 = vpack.c.bf16 %v292_v49, %v291_v48  ;;  %v57_v58 = vld [vmem:[%s3248_s0 + $0x70] sm:$0xff] }
  0x10   :  { %2274 = vmatprep.subr.bf16.mxu0 %v2437_v8  ;;  %2305 = vmatpush3.bf16.msra.mxu1 %v2444_v11  ;;  %v2453_v52 = vld [vmem:[%s3255_s7 + $0x20] sm:$0xff]   ;;  %v65_v56 = vpack.c.bf16 %v56_v51, %v55_v50  ;;  %v2454_v57 = vld [vmem:[%s3255_s7 + $0x28] sm:$0xff]   ;;  %v293_v59 = vld [vmem:[%s3249_s1 + $0x50] sm:$0xff] }
  0x11   :  { %2306 = vmatprep.subr.bf16.mxu1 %v2445_v13  ;;  %v294_v60 = vld [vmem:[%s3249_s1 + $0x58] sm:$0xff] }
  0x13   :  { %2275 = vmatpush3.bf16.msra.mxu0 %v2437_v8 }
  0x14   :  { %2276 = vmatprep.subr.bf16.mxu0 %v2438_v12  ;;  %2307 = vmatpush3.bf16.msra.mxu1 %v2445_v13 }
  0x15   :  { %2308 = vmatprep.subr.bf16.mxu1 %v2446_v18 }
  0x17   :  { %2277 = vmatpush3.bf16.msra.mxu0 %v2438_v12 }
  0x18   :  { %2278 = vmatprep.subr.bf16.mxu0 %v2439_v14  ;;  %2309 = vmatpush3.bf16.msra.mxu1 %v2446_v18 }
  0x19   :  { %2310 = vmatprep.subr.bf16.mxu1 %v2447_v24 }
  0x1b   :  { %2279 = vmatpush3.bf16.msra.mxu0 %v2439_v14 }
  0x1c   :  { %2280 = vmatprep.subr.bf16.mxu0 %v2441_v19  ;;  %2311 = vmatpush3.bf16.msra.mxu1 %v2447_v24 }
  0x1d   :  { %2312 = vmatprep.subr.bf16.mxu1 %v2448_v28 }
  0x1f   :  { %2281 = vmatpush3.bf16.msra.mxu0 %v2441_v19 }
  0x20   :  { %2330 = vmatprep.subr.bf16.mxu0 %v2449_v25  ;;  %2313 = vmatpush3.bf16.msra.mxu1 %v2448_v28 }
  0x22   :  { %2283 = vmatmul.mubr.bf16.vlgmr.msra.gmra.mrb[0].mxu0 %v60_v26 }
  0x23   :  { %2286 = vmatprep.mubr.bf16.mxu0 %v61_v27  ;;  %2331 = vmatpush3.bf16.msra.mxu0 %v2449_v25 }
  0x24   :  { %2332 = vmatprep.subr.bf16.mxu0 %v2450_v31  ;;  %2315 = vmatmul.mubr.bf16.vlgmr.msra.gmra.mrb[0].mxu1 %v300_v39 }
  0x25   :  { %2318 = vmatprep.mubr.bf16.mxu1 %v301_v41 }
  0x27   :  { %2333 = vmatpush3.bf16.msra.mxu0 %v2450_v31 }
  0x28   :  { %2334 = vmatprep.subr.bf16.mxu0 %v2451_v38 }
  0x2a   :  { %2287 = vmatmul.mubr.bf16.gmra.mrb[4].mxu0 %v62_v40 }
  0x2b   :  { %2290 = vmatprep.mubr.bf16.mxu0 %v63_v42  ;;  %2335 = vmatpush3.bf16.msra.mxu0 %v2451_v38 }
  0x2c   :  { %2336 = vmatprep.subr.bf16.mxu0 %v2452_v43  ;;  %2319 = vmatmul.mubr.bf16.gmra.mrb[4].mxu1 %v302_v53 }
  0x2d   :  { %2322 = vmatprep.mubr.bf16.mxu1 %v303_v55 }
  0x2f   :  { %2337 = vmatpush3.bf16.msra.mxu0 %v2452_v43 }
  0x30   :  { %2338 = vmatprep.subr.bf16.mxu0 %v2453_v52 }
  0x32   :  { %2291 = vmatmul.mubr.bf16.gmra.mrb[8].mxu0 %v64_v54 }
  0x33   :  { %21 = vsyncpa [#allocation5], 0  ;;  %2294 = vmatprep.mubr.bf16.mxu0 %v65_v56  ;;  %v58_v61 = vld [vmem:[%s3248_s0 + $0x78] sm:$0xff]  ;;  %v295_v62 = vld [vmem:[%s3249_s1 + $0x60] sm:$0xff]  ;;  %2339 = vmatpush3.bf16.msra.mxu0 %v2453_v52  ;;  %v304_v0 = vpack.c.bf16 %v294_v60, %v293_v59  ;;  %s2546_s26 = smov [#allocation2]  }
  0x34   :  { %v296_v63 = vld [vmem:[%s3249_s1 + $0x68] sm:$0xff]  ;;  %2340 = vmatprep.subr.bf16.mxu0 %v2454_v57  ;;  %v66_v1 = vpack.c.bf16 %v58_v61, %v57_v58  ;;  %v297_v3 = vld [vmem:[%s3249_s1 + $0x70] sm:$0xff]  ;;  %v298_v4 = vld [vmem:[%s3249_s1 + $0x78] sm:$0xff]  ;;  %s1694_s27 = sshll.u32 %s2546_s26, 4  ;;  %s1695_s27 = int_to_ptr.vmem [resolvable:$true] %s1694_s27 }
  0x35   :  { %v305_v2 = vpack.c.bf16 %v296_v63, %v295_v62  ;;  %2323 = vmatmul.mubr.bf16.gmra.mrb[8].mxu1 %v304_v0  ;;  %v306_v5 = vpack.c.bf16 %v298_v4, %v297_v3  ;;  %v2455_v6 = vld [vmem:[%s3255_s7 + $0x30] sm:$0xff]   ;;  %v2456_v7 = vld [vmem:[%s3256_s8] sm:$0xff]   ;;  %v2457_v8 = vld [vmem:[%s3255_s7 + $0x38] sm:$0xff]   ;;  %s2497_s28 = scalar_lea.vmem %s1695_s27, 2048  ;;  %p2502_p1 = scmp.lt.s32.totalorder %s1695_s27, %s1695_s27 }
  0x36   :  { %2362 = vmatprep.subr.bf16.mxu1 %v2456_v7  ;;  %v2458_v9 = vld [vmem:[%s3256_s8 + $0x8] sm:$0xff]   ;;  %v2461_v10 = vld [vmem:[%s3257_s9 + $0x4] ss:$12 sps:$4 sm:$0xff]   ;;  %v2466_v12 = vld [vmem:[%s3256_s8 + $0x18] sm:$0xff]   ;;  %p2498_p0 = scmp.ne.s32.totalorder %s1695_s27, %s2497_s28  ;;  %p2503_p2 = scmp.lt.s32.totalorder %s2497_s28, %s2497_s28 }
  0x37   :  { %2341 = vmatpush3.bf16.msra.mxu0 %v2454_v57  ;;  %2326 = vmatprep.mubr.bf16.mxu1 %v305_v2  ;;  %v2462_v11 = vld [vmem:[%s3256_s8 + $0x10] sm:$0xff]   ;;  %v2470_v13 = vld [vmem:[%s3256_s8 + $0x20] sm:$0xff]   ;;  %v2474_v14 = vld [vmem:[%s3256_s8 + $0x28] sm:$0xff]  }
  0x38   :  { %2342 = vmatprep.subr.bf16.mxu0 %v2455_v6  ;;  %2363 = vmatpush3.bf16.msra.mxu1 %v2456_v7  ;;  %v2478_v15 = vld [vmem:[%s3256_s8 + $0x30] sm:$0xff]   ;;  %v2482_v16 = vld [vmem:[%s3256_s8 + $0x38] sm:$0xff]   ;;  %v2831_v18 = vld [vmem:[%s3252_s4] ss:$0 sm:$0xff]  ;;  %p2504_p3 = por %p2503_p2, %p2502_p1 }
  0x39   :  { %2364 = vmatprep.subr.bf16.mxu1 %v2458_v9  ;;  %v2825_v17 = vld [vmem:[%s3257_s9 + $0x8] ss:$12 sps:$4 sm:$0xff]   ;;  %v2840_v31 = vld [vmem:[%s3254_s6] ss:$0 sm:$0xff]  ;;  %v2463_v56 = vld [vmem:[%s3257_s9 + $0x18] ss:$12 sps:$4 sm:$0xff]  }
  0x3a   :  { %2295 = vmatmul.mubr.bf16.gmra.mrb[12].mxu0 %v66_v1  ;;  %v2459_v44 = vld [vmem:[%s3257_s9] ss:$12 sps:$4 sm:$0xff]   ;;  %v2465_v45 = vld [vmem:[%s3257_s9 + $0x1c] ss:$12 sps:$4 sm:$0xff]   ;;  %p2505_p4 = pnand %p2504_p3, %p2498_p0 }
  0x3b   :  { %2343 = vmatpush3.bf16.msra.mxu0 %v2455_v6  ;;  %v2469_v59 = vld [vmem:[%s3257_s9 + $0x34] ss:$12 sps:$4 sm:$0xff]   ;;  %v572_v3 = vld [vmem:[%s3250_s2 + $0x8] sm:$0xff] }
  0x3c   :  { %2344 = vmatprep.subr.bf16.mxu0 %v2457_v8  ;;  %2365 = vmatpush3.bf16.msra.mxu1 %v2458_v9  ;;  %v571_v2 = vld [vmem:[%s3250_s2] sm:$0xff] }
  0x3d   :  { %2327 = vmatmul.mubr.bf16.gmra.mrb[12].mxu1 %v306_v5  ;;  %2366 = vmatprep.subr.bf16.mxu1 %v2462_v11 }
  0x3f   :  { %2345 = vmatpush3.bf16.msra.mxu0 %v2457_v8 }
  0x40   :  { %1237 = vmatprep.subr.bf16.mxu0 %v2461_v10  ;;  %2367 = vmatpush3.bf16.msra.mxu1 %v2462_v11 }
  0x41   :  { %2368 = vmatprep.subr.bf16.mxu1 %v2466_v12 }
  0x44   :  { %2369 = vmatpush3.bf16.msra.mxu1 %v2466_v12 }
  0x45   :  { %2370 = vmatprep.subr.bf16.mxu1 %v2470_v13 }
  0x48   :  { %2371 = vmatpush3.bf16.msra.mxu1 %v2470_v13 }
  0x49   :  { %2372 = vmatprep.subr.bf16.mxu1 %v2474_v14 }
  0x4c   :  { %2373 = vmatpush3.bf16.msra.mxu1 %v2474_v14 }
  0x4d   :  { %2374 = vmatprep.subr.bf16.mxu1 %v2478_v15 }
  0x50   :  { %2375 = vmatpush3.bf16.msra.mxu1 %v2478_v15 }
  0x51   :  { %2376 = vmatprep.subr.bf16.mxu1 %v2482_v16 }
  0x54   :  { %2377 = vmatpush3.bf16.msra.mxu1 %v2482_v16 }
  0x55   :  { %2394 = vmatprep.subr.bf16.mxu1 %v2825_v17 }
  0xf5   :  { %v2284_v19 = vpop.f32.mrb[0].mxu0 }
  0xf6   :  { %v181_v20 = vadd.f32 %v2284_v19, %v2831_v18  ;;  %v172_v21 = vpop.f32.mrb[1].mxu0  ;;  %v2467_v19 = vld [vmem:[%s3257_s9 + $0x30] ss:$12 sps:$4 sm:$0xff]  }
  0xf7   :  { %v173_v22 = vadd.f32 %v2831_v18, %v172_v21  ;;  %v2285_v23 = vpop.f32.mrb[2].mxu0  ;;  %v2316_v35 = vpop.f32.mrb[0].mxu1 }
  0xf8   :  { %vm237_vm0 = vcmp.ge.f32.partialorder %v181_v20, 0.0  ;;  %v253_v24 = vmul.f32 0.01, %v181_v20  ;;  %v184_v25 = vadd.f32 %v2285_v23, %v2831_v18  ;;  %v175_v26 = vpop.f32.mrb[3].mxu0  ;;  %v421_v39 = vadd.f32 %v2316_v35, %v2840_v31  ;;  %v412_v40 = vpop.f32.mrb[1].mxu1 }
  0xf9   :  { %vm235_vm1 = vcmp.ge.f32.partialorder %v173_v22, 0.0  ;;  %v251_v27 = vmul.f32 0.01, %v173_v22  ;;  %v176_v28 = vadd.f32 %v2831_v18, %v175_v26  ;;  %v413_v46 = vadd.f32 %v2840_v31, %v412_v40  ;;  %v2317_v47 = vpop.f32.mrb[2].mxu1 }
  0xfa   :  { %v269_v29 = vsel %vm237_vm0, %v181_v20, %v253_v24  ;;  %vm238_vm2 = vcmp.ge.f32.partialorder %v184_v25, 0.0  ;;  %v254_v30 = vmul.f32 0.01, %v184_v25  ;;  %vm477_vm4 = vcmp.ge.f32.partialorder %v421_v39, 0.0  ;;  %v415_v52 = vpop.f32.mrb[3].mxu1 }
  0xfb   :  { %525 = vst [vmem:[%s3258_s10 + $0x10] sm:$0xff] %v269_v29  ;;  %vm236_vm3 = vcmp.ge.f32.partialorder %v176_v28, 0.0  ;;  %v252_v32 = vmul.f32 0.01, %v176_v28  ;;  %v267_v33 = vsel %vm235_vm1, %v173_v22, %v251_v27  ;;  %v493_v50 = vmul.f32 0.01, %v421_v39 }
  0xfc   :  { %v270_v34 = vsel %vm238_vm2, %v184_v25, %v254_v30  ;;  %523 = vst [vmem:[%s3258_s10] sm:$0xff] %v267_v33  ;;  %v424_v51 = vadd.f32 %v2317_v47, %v2840_v31  ;;  %vm475_vm6 = vcmp.ge.f32.partialorder %v413_v46, 0.0  ;;  %v491_v63 = vmul.f32 0.01, %v413_v46  ;;  %v2473_v20 = vld [vmem:[%s3257_s9 + $0x4c] ss:$12 sps:$4 sm:$0xff]  }
  0xfd   :  { %526 = vst [vmem:[%s3258_s10 + $0x18] sm:$0xff] %v270_v34  ;;  %v556_v36 = vpack.c.bf16 %v270_v34, %v269_v29  ;;  %v2288_v37 = vpop.f32.mrb[4].mxu0  ;;  %v268_v38 = vsel %vm236_vm3, %v176_v28, %v252_v32  ;;  %v2874_v60 = vsel %vm477_vm4, %v421_v39, %v493_v50  ;;  %v2891_v6 = vadd.f32 %v2840_v31, %v415_v52  ;;  %v2475_v50 = vld [vmem:[%s3257_s9 + $0x60] ss:$12 sps:$4 sm:$0xff]  }
  0xfe   :  { %v197_v41 = vadd.f32 %v2288_v37, %v2831_v18  ;;  %v188_v42 = vpop.f32.mrb[5].mxu0  ;;  %524 = vst [vmem:[%s3258_s10 + $0x8] sm:$0xff] %v268_v38  ;;  %v555_v43 = vpack.c.bf16 %v268_v38, %v267_v33  ;;  %541 = vst [vmem:[#allocation2 + $0x10] sm:$0xff] %v2874_v60  ;;  %vm478_vm10 = vcmp.ge.f32.partialorder %v424_v51, 0.0  ;;  %v494_v5 = vmul.f32 0.01, %v424_v51 }
  0xff   :  { %v189_v48 = vadd.f32 %v2831_v18, %v188_v42  ;;  %v2289_v49 = vpop.f32.mrb[6].mxu0  ;;  %v2320_v7 = vpop.f32.mrb[4].mxu1  ;;  %v2894_v8 = vsel %vm475_vm6, %v413_v46, %v491_v63  ;;  %v2916_v23 = vpack.c.bf16 %v572_v3, %v571_v2  ;;  %vm476_vm11 = vcmp.ge.f32.partialorder %v2891_v6, 0.0  ;;  %v2471_v38 = vld [vmem:[%s3257_s9 + $0x48] ss:$12 sps:$4 sm:$0xff]  }
 0x100   :  { %vm241_vm5 = vcmp.ge.f32.partialorder %v197_v41, 0.0  ;;  %v257_v53 = vmul.f32 0.01, %v197_v41  ;;  %v200_v54 = vadd.f32 %v2289_v49, %v2831_v18  ;;  %v191_v55 = vpop.f32.mrb[7].mxu0  ;;  %2346 = vmatprep.mubr.bf16.mxu0 %v555_v43  ;;  %v2900_v12 = vadd.f32 %v2320_v7, %v2840_v31  ;;  %v428_v13 = vpop.f32.mrb[5].mxu1  ;;  %539 = vst [vmem:[#allocation2] sm:$0xff] %v2894_v8 }
 0x101   :  { %vm239_vm7 = vcmp.ge.f32.partialorder %v189_v48, 0.0  ;;  %v255_v57 = vmul.f32 0.01, %v189_v48  ;;  %v192_v58 = vadd.f32 %v2831_v18, %v191_v55  ;;  %2347 = vmatmul.mubr.bf16.vlgmr.msra.gmra.mrb[16].mxu0 %v556_v36  ;;  %v2914_v21 = vsel %vm478_vm10, %v424_v51, %v494_v5  ;;  %v2321_v22 = vpop.f32.mrb[6].mxu1  ;;  %v2477_v43 = vld [vmem:[%s3257_s9 + $0x64] ss:$12 sps:$4 sm:$0xff]  }
 0x102   :  { %vm242_vm8 = vcmp.ge.f32.partialorder %v200_v54, 0.0  ;;  %v258_v61 = vmul.f32 0.01, %v200_v54  ;;  %1238 = vmatpush1.bf16.msra.mxu0 %v2459_v44  ;;  %v273_v62 = vsel %vm241_vm5, %v197_v41, %v257_v53  ;;  %542 = vst [vmem:[#allocation2 + $0x18] sm:$0xff] %v2914_v21  ;;  %v564_v26 = vpack.c.bf16 %v2914_v21, %v2874_v60  ;;  %v431_v28 = vpop.f32.mrb[7].mxu1 }
 0x103   :  { %vm240_vm9 = vcmp.ge.f32.partialorder %v192_v58, 0.0  ;;  %v256_v0 = vmul.f32 0.01, %v192_v58  ;;  %1239 = vmatprep.subr.bf16.mxu0 %v2465_v45  ;;  %v271_v1 = vsel %vm239_vm7, %v189_v48, %v255_v57  ;;  %529 = vst [vmem:[%s3258_s10 + $0x30] sm:$0xff] %v273_v62  ;;  %v492_v27 = vmul.f32 0.01, %v2891_v6 }
 0x104   :  { %527 = vst [vmem:[%s3258_s10 + $0x20] sm:$0xff] %v271_v1  ;;  %v274_v4 = vsel %vm242_vm8, %v200_v54, %v258_v61  ;;  %v2926_v33 = vmul.f32 0.01, %v2900_v12  ;;  %v2930_v36 = vadd.f32 %v2840_v31, %v428_v13  ;;  %vm481_vm15 = vcmp.ge.f32.partialorder %v2900_v12, 0.0  ;;  %v2490_v63 = vld [vmem:[%s3257_s9 + $0x20] ss:$12 sps:$4 sm:$0xff]  }
 0x105   :  { %v2292_v9 = vpop.f32.mrb[8].mxu0  ;;  %v272_v10 = vsel %vm240_vm9, %v192_v58, %v256_v0  ;;  %530 = vst [vmem:[%s3258_s10 + $0x38] sm:$0xff] %v274_v4  ;;  %v558_v11 = vpack.c.bf16 %v274_v4, %v273_v62  ;;  %v2937_v40 = vadd.f32 %v2321_v22, %v2840_v31  ;;  %v432_v52 = vadd.f32 %v2840_v31, %v431_v28  ;;  %v2481_v58 = vld [vmem:[%s3257_s9 + $0x7c] ss:$12 sps:$4 sm:$0xff]  }
 0x106   :  { %v213_v14 = vadd.f32 %v2292_v9, %v2831_v18  ;;  %1240 = vmatpush1.bf16.msra.mxu0 %v2463_v56  ;;  %v204_v15 = vpop.f32.mrb[9].mxu0  ;;  %528 = vst [vmem:[%s3258_s10 + $0x28] sm:$0xff] %v272_v10  ;;  %v557_v16 = vpack.c.bf16 %v272_v10, %v271_v1  ;;  %vm479_vm1 = vcmp.ge.f32.partialorder %v2930_v36, 0.0  ;;  %v2950_v45 = vmul.f32 0.01, %v2930_v36 }
 0x107   :  { %v205_v24 = vadd.f32 %v2831_v18, %v204_v15  ;;  %v2293_v25 = vpop.f32.mrb[10].mxu0  ;;  %1241 = vmatprep.subr.bf16.mxu0 %v2469_v59  ;;  %vm482_vm2 = vcmp.ge.f32.partialorder %v2937_v40, 0.0  ;;  %v2954_v46 = vmul.f32 0.01, %v2937_v40  ;;  %v508_v53 = vsel %vm476_vm11, %v2891_v6, %v492_v27 }
 0x108   :  { %vm245_vm12 = vcmp.ge.f32.partialorder %v213_v14, 0.0  ;;  %v261_v29 = vmul.f32 0.01, %v213_v14  ;;  %v216_v30 = vadd.f32 %v2293_v25, %v2831_v18  ;;  %v207_v32 = vpop.f32.mrb[11].mxu0  ;;  %2350 = vmatprep.mubr.bf16.mxu0 %v557_v16  ;;  %v2324_v47 = vpop.f32.mrb[8].mxu1  ;;  %540 = vst [vmem:[#allocation2 + $0x8] sm:$0xff] %v508_v53  ;;  %v563_v59 = vpack.c.bf16 %v508_v53, %v2894_v8 }
 0x109   :  { %vm243_vm13 = vcmp.ge.f32.partialorder %v205_v24, 0.0  ;;  %v259_v34 = vmul.f32 0.01, %v205_v24  ;;  %v208_v35 = vadd.f32 %v2831_v18, %v207_v32  ;;  %2351 = vmatmul.mubr.bf16.gmra.mrb[20].mxu0 %v558_v11  ;;  %v444_v54 = vpop.f32.mrb[9].mxu1  ;;  %v2975_v61 = vadd.f32 %v2324_v47, %v2840_v31  ;;  %v2479_v8 = vld [vmem:[%s3257_s9 + $0x78] ss:$12 sps:$4 sm:$0xff]  }
 0x10a   :  { %vm246_vm14 = vcmp.ge.f32.partialorder %v216_v30, 0.0  ;;  %v262_v37 = vmul.f32 0.01, %v216_v30  ;;  %1242 = vmatpush1.bf16.msra.mxu0 %v2467_v19  ;;  %v277_v39 = vsel %vm245_vm12, %v213_v14, %v261_v29  ;;  %v2325_v62 = vpop.f32.mrb[10].mxu1  ;;  %vm480_vm3 = vcmp.ge.f32.partialorder %v432_v52, 0.0  ;;  %2378 = vmatprep.mubr.bf16.mxu1 %v563_v59 }
 0x10b   :  { %vm244_vm0 = vcmp.ge.f32.partialorder %v208_v35, 0.0  ;;  %v260_v41 = vmul.f32 0.01, %v208_v35  ;;  %1243 = vmatprep.subr.bf16.mxu0 %v2473_v20  ;;  %v275_v42 = vsel %vm243_vm13, %v205_v24, %v259_v34  ;;  %533 = vst [vmem:[%s3258_s10 + $0x50] sm:$0xff] %v277_v39  ;;  %v496_v2 = vmul.f32 0.01, %v432_v52  ;;  %2379 = vmatmul.mubr.bf16.vlgmr.msra.gmra.mrb[16].mxu1 %v564_v26 }
 0x10c   :  { %531 = vst [vmem:[%s3258_s10 + $0x40] sm:$0xff] %v275_v42  ;;  %v278_v44 = vsel %vm246_vm14, %v216_v30, %v262_v37  ;;  %v2982_v3 = vadd.f32 %v2840_v31, %v444_v54  ;;  %v447_v4 = vpop.f32.mrb[11].mxu1  ;;  %vm485_vm5 = vcmp.ge.f32.partialorder %v2975_v61, 0.0  ;;  %v2485_v11 = vld [vmem:[%s3257_s9 + $0x94] ss:$12 sps:$4 sm:$0xff]   ;;  %2395 = vmatpush3.bf16.msra.mxu1 %v2825_v17  ;;  %v456_v20 = vadd.f32 %v2325_v62, %v2840_v31 }
 0x10d   :  { %v2296_v48 = vpop.f32.mrb[12].mxu0  ;;  %v276_v49 = vsel %vm244_vm0, %v208_v35, %v260_v41  ;;  %534 = vst [vmem:[%s3258_s10 + $0x58] sm:$0xff] %v278_v44  ;;  %v560_v51 = vpack.c.bf16 %v278_v44, %v277_v39  ;;  %v2997_v13 = vmul.f32 0.01, %v2975_v61  ;;  %2396 = vmatprep.subr.bf16.mxu1 %v2490_v63  ;;  %v448_v21 = vadd.f32 %v2840_v31, %v447_v4  ;;  %v2483_v26 = vld [vmem:[%s3257_s9 + $0x90] ss:$12 sps:$4 sm:$0xff]  }
 0x10e   :  { %v229_v55 = vadd.f32 %v2296_v48, %v2831_v18  ;;  %1244 = vmatpush1.bf16.msra.mxu0 %v2471_v38  ;;  %v220_v56 = vpop.f32.mrb[13].mxu0  ;;  %532 = vst [vmem:[%s3258_s10 + $0x48] sm:$0xff] %v276_v49  ;;  %v559_v57 = vpack.c.bf16 %v276_v49, %v275_v42  ;;  %vm483_vm8 = vcmp.ge.f32.partialorder %v2982_v3, 0.0  ;;  %v499_v19 = vmul.f32 0.01, %v2982_v3 }
 0x10f   :  { %v221_v0 = vadd.f32 %v2831_v18, %v220_v56  ;;  %v2297_v1 = vpop.f32.mrb[14].mxu0  ;;  %1245 = vmatprep.subr.bf16.mxu0 %v2477_v43  ;;  %v511_v22 = vsel %vm479_vm1, %v2930_v36, %v2950_v45  ;;  %v512_v28 = vsel %vm480_vm3, %v432_v52, %v496_v2  ;;  %v513_v29 = vsel %vm481_vm15, %v2900_v12, %v2926_v33  ;;  %v2488_v36 = vld [vmem:[%s3257_s9 + $0xac] ss:$12 sps:$4 sm:$0xff]   ;;  %v2486_v41 = vld [vmem:[%s3257_s9 + $0xa8] ss:$12 sps:$4 sm:$0xff]  }
 0x110   :  { %vm249_vm4 = vcmp.ge.f32.partialorder %v229_v55, 0.0  ;;  %v265_v5 = vmul.f32 0.01, %v229_v55  ;;  %v232_v6 = vadd.f32 %v2297_v1, %v2831_v18  ;;  %v223_v7 = vpop.f32.mrb[15].mxu0  ;;  %2354 = vmatprep.mubr.bf16.mxu0 %v559_v57  ;;  %v2328_v24 = vpop.f32.mrb[12].mxu1  ;;  %543 = vst [vmem:[#allocation2 + $0x20] sm:$0xff] %v511_v22  ;;  %2397 = vmatpush3.bf16.msra.mxu1 %v2490_v63  ;;  %v565_v33 = vpack.c.bf16 %v512_v28, %v511_v22 }
 0x111   :  { %vm247_vm6 = vcmp.ge.f32.partialorder %v221_v0, 0.0  ;;  %v263_v9 = vmul.f32 0.01, %v221_v0  ;;  %v224_v10 = vadd.f32 %v2831_v18, %v223_v7  ;;  %2355 = vmatmul.mubr.bf16.gmra.mrb[24].mxu0 %v560_v51  ;;  %v3005_v18 = vld [vmem:[%s3257_s9 + $0x38] ss:$12 sps:$4 sm:$0xff]   ;;  %v460_v30 = vpop.f32.mrb[13].mxu1  ;;  %v514_v37 = vsel %vm482_vm2, %v2937_v40, %v2954_v46 }
 0x112   :  { %vm250_vm7 = vcmp.ge.f32.partialorder %v232_v6, 0.0  ;;  %v266_v14 = vmul.f32 0.01, %v232_v6  ;;  %1246 = vmatpush1.bf16.msra.mxu0 %v2475_v50  ;;  %v281_v15 = vsel %vm249_vm4, %v229_v55, %v265_v5  ;;  %vm486_vm10 = vcmp.ge.f32.partialorder %v456_v20, 0.0  ;;  %544 = vst [vmem:[#allocation2 + $0x28] sm:$0xff] %v512_v28  ;;  %545 = vst [vmem:[#allocation2 + $0x30] sm:$0xff] %v513_v29  ;;  %2398 = vmatprep.subr.bf16.mxu1 %v3005_v18 }
 0x113   :  { %vm248_vm9 = vcmp.ge.f32.partialorder %v224_v10, 0.0  ;;  %v264_v60 = vmul.f32 0.01, %v224_v10  ;;  %1247 = vmatprep.subr.bf16.mxu0 %v2481_v58  ;;  %v279_v16 = vsel %vm247_vm6, %v221_v0, %v263_v9  ;;  %537 = vst [vmem:[%s3258_s10 + $0x70] sm:$0xff] %v281_v15  ;;  %v502_v34 = vmul.f32 0.01, %v456_v20  ;;  %2382 = vmatprep.mubr.bf16.mxu1 %v565_v33 }
 0x114   :  { %535 = vst [vmem:[%s3258_s10 + $0x60] sm:$0xff] %v279_v16  ;;  %v282_v17 = vsel %vm250_vm7, %v232_v6, %v266_v14  ;;  %vm484_vm11 = vcmp.ge.f32.partialorder %v448_v21, 0.0  ;;  %v2329_v35 = vpop.f32.mrb[14].mxu1  ;;  %v500_v12 = vmul.f32 0.01, %v448_v21  ;;  %v469_v38 = vadd.f32 %v2328_v24, %v2840_v31  ;;  %546 = vst [vmem:[#allocation2 + $0x38] sm:$0xff] %v514_v37  ;;  %2399 = vmatpush3.bf16.msra.mxu1 %v3005_v18 }
 0x115   :  { %v280_v25 = vsel %vm248_vm9, %v224_v10, %v264_v60  ;;  %538 = vst [vmem:[%s3258_s10 + $0x78] sm:$0xff] %v282_v17  ;;  %v562_v27 = vpack.c.bf16 %v282_v17, %v281_v15  ;;  %v463_v39 = vpop.f32.mrb[15].mxu1  ;;  %v566_v42 = vpack.c.bf16 %v514_v37, %v513_v29  ;;  %v461_v43 = vadd.f32 %v2840_v31, %v460_v30  ;;  %v2492_v48 = vld [vmem:[%s3257_s9 + $0x50] ss:$12 sps:$4 sm:$0xff]   ;;  %v2493_v59 = vld [vmem:[%s3257_s9 + $0x68] ss:$12 sps:$4 sm:$0xff]  }
 0x116   :  { %1248 = vmatpush1.bf16.msra.mxu0 %v2479_v8  ;;  %536 = vst [vmem:[%s3258_s10 + $0x68] sm:$0xff] %v280_v25  ;;  %v561_v32 = vpack.c.bf16 %v280_v25, %v279_v16  ;;  %v472_v44 = vadd.f32 %v2329_v35, %v2840_v31  ;;  %v464_v45 = vadd.f32 %v2840_v31, %v463_v39  ;;  %vm489_vm12 = vcmp.ge.f32.partialorder %v469_v38, 0.0  ;;  %v2494_v0 = vld [vmem:[%s3257_s9 + $0x80] ss:$12 sps:$4 sm:$0xff]   ;;  %v573_v1 = vld [vmem:[%s3250_s2 + $0x10] sm:$0xff]  ;;  %v574_v2 = vld [vmem:[%s3250_s2 + $0x18] sm:$0xff] }
 0x117   :  { %1249 = vmatprep.subr.bf16.mxu0 %v2485_v11  ;;  %v505_v40 = vmul.f32 0.01, %v469_v38  ;;  %v515_v46 = vsel %vm483_vm8, %v2982_v3, %v499_v19  ;;  %v516_v47 = vsel %vm484_vm11, %v448_v21, %v500_v12  ;;  %v2545_v49 = vmov 0   ;;  %2383 = vmatmul.mubr.bf16.gmra.mrb[20].mxu1 %v566_v42  ;;  %v2495_v4 = vld [vmem:[%s3257_s9 + $0x98] ss:$12 sps:$4 sm:$0xff]   ;;  %v576_v7 = vld [vmem:[%s3250_s2 + $0x28] sm:$0xff] }
 0x118   :  { %2358 = vmatprep.mubr.bf16.mxu0 %v561_v32  ;;  %vm487_vm13 = vcmp.ge.f32.partialorder %v461_v43, 0.0  ;;  %v503_v31 = vmul.f32 0.01, %v461_v43  ;;  %vm490_vm14 = vcmp.ge.f32.partialorder %v472_v44, 0.0  ;;  %v506_v50 = vmul.f32 0.01, %v472_v44  ;;  %2400 = vmatprep.subr.bf16.mxu1 %v2492_v48 }
 0x119   :  { %2359 = vmatmul.mubr.bf16.gmra.mrb[28].mxu0 %v562_v27  ;;  %547 = vst [vmem:[#allocation2 + $0x40] sm:$0xff] %v515_v46  ;;  %548 = vst [vmem:[#allocation2 + $0x48] sm:$0xff] %v516_v47  ;;  %vm488_vm15 = vcmp.ge.f32.partialorder %v464_v45, 0.0  ;;  %v504_v51 = vmul.f32 0.01, %v464_v45  ;;  %v567_v52 = vpack.c.bf16 %v516_v47, %v515_v46  ;;  %v517_v53 = vsel %vm485_vm5, %v2975_v61, %v2997_v13  ;;  %v575_v6 = vld [vmem:[%s3250_s2 + $0x20] sm:$0xff] }
 0x11a   :  { %1250 = vmatpush1.bf16.msra.mxu0 %v2483_v26  ;;  %1269 = vmatprep.mubr.bf16.mxu0 %v2545_v49  ;;  %v518_v54 = vsel %vm486_vm10, %v456_v20, %v502_v34  ;;  %549 = vst [vmem:[#allocation2 + $0x50] sm:$0xff] %v517_v53  ;;  %v519_v55 = vsel %vm487_vm13, %v461_v43, %v503_v31  ;;  %v2496_v5 = vld [vmem:[%s3257_s9 + $0xb0] ss:$12 sps:$4 sm:$0xff]   ;;  %v580_v13 = vld [vmem:[%s3250_s2 + $0x48] sm:$0xff]  ;;  %v583_v60 = vld [vmem:[%s3250_s2 + $0x60] sm:$0xff] }
 0x11b   :  { %1251 = vmatprep.subr.bf16.mxu0 %v2488_v36  ;;  %v521_v56 = vsel %vm489_vm12, %v469_v38, %v505_v40  ;;  %v522_v57 = vsel %vm490_vm14, %v472_v44, %v506_v50  ;;  %2386 = vmatprep.mubr.bf16.mxu1 %v567_v52  ;;  %550 = vst [vmem:[#allocation2 + $0x58] sm:$0xff] %v518_v54  ;;  %551 = vst [vmem:[#allocation2 + $0x60] sm:$0xff] %v519_v55  ;;  %v577_v9 = vld [vmem:[%s3250_s2 + $0x30] sm:$0xff]  ;;  %v578_v10 = vld [vmem:[%s3250_s2 + $0x38] sm:$0xff] }
 0x11c   :  { %v568_v58 = vpack.c.bf16 %v518_v54, %v517_v53  ;;  %v520_v62 = vsel %vm488_vm15, %v464_v45, %v504_v51  ;;  %553 = vst [vmem:[#allocation2 + $0x70] sm:$0xff] %v521_v56  ;;  %554 = vst [vmem:[#allocation2 + $0x78] sm:$0xff] %v522_v57  ;;  %v570_v61 = vpack.c.bf16 %v522_v57, %v521_v56  ;;  %2401 = vmatpush3.bf16.msra.mxu1 %v2492_v48  ;;  %v581_v15 = vld [vmem:[%s3250_s2 + $0x50] sm:$0xff]  ;;  %v582_v18 = vld [vmem:[%s3250_s2 + $0x58] sm:$0xff] }
 0x11d   :  { %552 = vst [vmem:[#allocation2 + $0x68] sm:$0xff] %v520_v62  ;;  %v569_v63 = vpack.c.bf16 %v520_v62, %v519_v55  ;;  %2402 = vmatprep.subr.bf16.mxu1 %v2493_v59  ;;  %v588_v3 = vpack.c.bf16 %v574_v2, %v573_v1  ;;  %v589_v8 = vpack.c.bf16 %v576_v7, %v575_v6  ;;  %v584_v16 = vld [vmem:[%s3250_s2 + $0x68] sm:$0xff]  ;;  %v585_v20 = vld [vmem:[%s3250_s2 + $0x70] sm:$0xff]  ;;  %v586_v21 = vld [vmem:[%s3250_s2 + $0x78] sm:$0xff] }
 0x11e   :  { %1252 = vmatpush1.bf16.msra.mxu0 %v2486_v41  ;;  %v590_v11 = vpack.c.bf16 %v578_v10, %v577_v9  ;;  %v592_v19 = vpack.c.bf16 %v582_v18, %v581_v15  ;;  %v593_v17 = vpack.c.bf16 %v584_v16, %v583_v60  ;;  %v594_v22 = vpack.c.bf16 %v586_v21, %v585_v20 }
 0x11f   :  { %2387 = vmatmul.mubr.bf16.gmra.mrb[24].mxu1 %v568_v58 }
 0x120   :  { %2390 = vmatprep.mubr.bf16.mxu1 %v569_v63  ;;  %2403 = vmatpush3.bf16.msra.mxu1 %v2493_v59 }
 0x121   :  { %1270 = vmatmul.mubr.bf16.vlgmr.msra.gmra.mrb[32].mxu0 %v2916_v23  ;;  %2404 = vmatprep.subr.bf16.mxu1 %v2494_v0 }
 0x122   :  { %1279 = vmatprep.mubr.bf16.mxu0 %v2545_v49 }
 0x124   :  { %2405 = vmatpush3.bf16.msra.mxu1 %v2494_v0 }
 0x125   :  { %2406 = vmatprep.subr.bf16.mxu1 %v2495_v4 }
 0x127   :  { %2391 = vmatmul.mubr.bf16.gmra.mrb[28].mxu1 %v570_v61 }
 0x128   :  { %2407 = vmatpush3.bf16.msra.mxu1 %v2495_v4  ;;  %2410 = vmatprep.mubr.bf16.mxu1 %v2916_v23  ;;  %v579_v23 = vld [vmem:[%s3250_s2 + $0x40] sm:$0xff] }
 0x129   :  { %1280 = vmatmul.mubr.bf16.gmra.mrb[36].mxu0 %v588_v3  ;;  %2408 = vmatprep.subr.bf16.mxu1 %v2496_v5  ;;  %v591_v14 = vpack.c.bf16 %v580_v13, %v579_v23 }
 0x12a   :  { %1289 = vmatprep.mubr.bf16.mxu0 %v2545_v49 }
 0x12c   :  { %2409 = vmatpush3.bf16.msra.mxu1 %v2496_v5 }
 0x12f   :  { %2411 = vmatmul.mubr.bf16.vlgmr.msra.gmra.mrb[32].mxu1 %v588_v3 }
 0x130   :  { %2414 = vmatprep.mubr.bf16.mxu1 %v589_v8 }
 0x131   :  { %1290 = vmatmul.mubr.bf16.gmra.mrb[40].mxu0 %v589_v8 }
 0x132   :  { %1299 = vmatprep.mubr.bf16.mxu0 %v2545_v49 }
 0x137   :  { %2415 = vmatmul.mubr.bf16.gmra.mrb[36].mxu1 %v590_v11 }
 0x138   :  { %2418 = vmatprep.mubr.bf16.mxu1 %v591_v14 }
 0x139   :  { %1300 = vmatmul.mubr.bf16.gmra.mrb[44].mxu0 %v590_v11 }
 0x13a   :  { %1309 = vmatprep.mubr.bf16.mxu0 %v2545_v49 }
 0x13f   :  { %2419 = vmatmul.mubr.bf16.gmra.mrb[40].mxu1 %v592_v19 }
 0x140   :  { %2422 = vmatprep.mubr.bf16.mxu1 %v593_v17 }
 0x141   :  { %1310 = vmatmul.mubr.bf16.gmra.mrb[48].mxu0 %v591_v14 }
 0x142   :  { %1319 = vmatprep.mubr.bf16.mxu0 %v2545_v49 }
 0x147   :  { %2423 = vmatmul.mubr.bf16.gmra.mrb[44].mxu1 %v594_v22 }
 0x149   :  { %1320 = vmatmul.mubr.bf16.gmra.mrb[52].mxu0 %v592_v19 }
 0x14a   :  { %1329 = vmatprep.mubr.bf16.mxu0 %v2545_v49 }
 0x151   :  { %1330 = vmatmul.mubr.bf16.gmra.mrb[56].mxu0 %v593_v17 }
 0x152   :  { %1339 = vmatprep.mubr.bf16.mxu0 %v2545_v49 }
 0x159   :  { %1340 = vmatmul.mubr.bf16.gmra.mrb[60].mxu0 %v594_v22 }
 0x15a   :  { %2508 = shalt.err (!%p2505_p4)
}
 0x15b   :  { %s2509_s30 = scalar_lea.hbm %s3259_s11, 2048 }
 0x15c   :  { %p2510_p5 = scmp.ne.s32.totalorder %s3259_s11, %s2509_s30  ;;  %p2513_p6 = scmp.lt.u32.totalorder %s2509_s30, %s3259_s11 }
 0x15e   :  { %p2515_p7 = pnand %p2513_p6, %p2510_p5 }
 0x160   :  { %2518 = shalt.err (!%p2515_p7)
}
 0x161   :  { %s2547_s17 = smov 128   ;;  %s2548_s18 = smov 8  }
 0x162   :  { %1700 = dma.vmem_to_hbm [thread:$0]  %s1695_s27, 2048, %s3259_s11, [#allocation3], %s2547_s17, %s2547_s17, %s2548_s18  }
 0x163   :  { %s2549_s23 = smov [#allocation4]  }
 0x164   :  { %s1710_s1 = sshll.u32 %s2549_s23, 4  ;;  %s1711_s1 = int_to_ptr.vmem [resolvable:$true] %s1710_s1 }
 0x165   :  { %s2519_s24 = scalar_lea.vmem %s1711_s1, 1024  ;;  %p2524_p9 = scmp.lt.s32.totalorder %s1711_s1, %s1711_s1 }
 0x166   :  { %p2520_p8 = scmp.ne.s32.totalorder %s1711_s1, %s2519_s24  ;;  %p2525_p10 = scmp.lt.s32.totalorder %s2519_s24, %s2519_s24 }
 0x168   :  { %p2526_p11 = por %p2525_p10, %p2524_p9 }
 0x16a   :  { %p2527_p12 = pnand %p2526_p11, %p2520_p8 }
 0x1d4   :  { %v2348_v24 = vpop.f32.mrb[16].mxu0 }
 0x1d5   :  { %v693_v25 = vpop.f32.mrb[17].mxu0 }
 0x1d6   :  { %v2349_v26 = vpop.f32.mrb[18].mxu0 }
 0x1d7   :  { %v1957_v27 = vpack.c.bf16 %v2349_v26, %v2348_v24  ;;  %v696_v28 = vpop.f32.mrb[19].mxu0 }
 0x1d8   :  { %v1952_v29 = vpack.c.bf16 %v696_v28, %v693_v25 }
 0x1d9   :  { %2149 = vst [vmem:[%s3260_s12 + $0x8] sm:$0xff] %v1957_v27  }
 0x1da   :  { %1953 = vst [vmem:[%s3260_s12] sm:$0xff] %v1952_v29  }
 0x1dc   :  { %v2352_v30 = vpop.f32.mrb[20].mxu0 }
 0x1dd   :  { %v709_v32 = vpop.f32.mrb[21].mxu0 }
 0x1de   :  { %v2353_v34 = vpop.f32.mrb[22].mxu0  ;;  %v2380_v37 = vpop.f32.mrb[16].mxu1 }
 0x1df   :  { %v1967_v35 = vpack.c.bf16 %v2353_v34, %v2352_v30  ;;  %v712_v36 = vpop.f32.mrb[23].mxu0  ;;  %v934_v39 = vpop.f32.mrb[17].mxu1 }
 0x1e0   :  { %v1962_v12 = vpack.c.bf16 %v712_v36, %v709_v32  ;;  %v2381_v42 = vpop.f32.mrb[18].mxu1 }
 0x1e1   :  { %2151 = vst [vmem:[%s3260_s12 + $0x18] sm:$0xff] %v1967_v35   ;;  %v1997_v45 = vpack.c.bf16 %v2381_v42, %v2380_v37  ;;  %v937_v40 = vpop.f32.mrb[19].mxu1 }
 0x1e2   :  { %2150 = vst [vmem:[%s3260_s12 + $0x10] sm:$0xff] %v1962_v12   ;;  %v1992_v47 = vpack.c.bf16 %v937_v40, %v934_v39 }
 0x1e3   :  { %2157 = vst [vmem:[%s3260_s12 + $0x48] sm:$0xff] %v1997_v45  }
 0x1e4   :  { %v2356_v33 = vpop.f32.mrb[24].mxu0  ;;  %2156 = vst [vmem:[%s3260_s12 + $0x40] sm:$0xff] %v1992_v47  }
 0x1e5   :  { %v725_v38 = vpop.f32.mrb[25].mxu0 }
 0x1e6   :  { %v2357_v41 = vpop.f32.mrb[26].mxu0 }
 0x1e7   :  { %v1977_v43 = vpack.c.bf16 %v2357_v41, %v2356_v33  ;;  %v728_v44 = vpop.f32.mrb[27].mxu0 }
 0x1e8   :  { %v1972_v46 = vpack.c.bf16 %v728_v44, %v725_v38 }
 0x1e9   :  { %2153 = vst [vmem:[%s3260_s12 + $0x28] sm:$0xff] %v1977_v43  }
 0x1ea   :  { %2152 = vst [vmem:[%s3260_s12 + $0x20] sm:$0xff] %v1972_v46   ;;  %v2384_v50 = vpop.f32.mrb[20].mxu1 }
 0x1eb   :  { %v950_v53 = vpop.f32.mrb[21].mxu1 }
 0x1ec   :  { %v2360_v48 = vpop.f32.mrb[28].mxu0  ;;  %v2385_v55 = vpop.f32.mrb[22].mxu1 }
 0x1ed   :  { %v741_v49 = vpop.f32.mrb[29].mxu0  ;;  %v2007_v56 = vpack.c.bf16 %v2385_v55, %v2384_v50  ;;  %v953_v57 = vpop.f32.mrb[23].mxu1 }
 0x1ee   :  { %v2361_v31 = vpop.f32.mrb[30].mxu0  ;;  %v2002_v58 = vpack.c.bf16 %v953_v57, %v950_v53 }
 0x1ef   :  { %v1987_v51 = vpack.c.bf16 %v2361_v31, %v2360_v48  ;;  %v744_v52 = vpop.f32.mrb[31].mxu0  ;;  %2159 = vst [vmem:[%s3260_s12 + $0x58] sm:$0xff] %v2007_v56  }
 0x1f0   :  { %v1982_v54 = vpack.c.bf16 %v744_v52, %v741_v49  ;;  %2158 = vst [vmem:[%s3260_s12 + $0x50] sm:$0xff] %v2002_v58  }
 0x1f1   :  { %2155 = vst [vmem:[%s3260_s12 + $0x38] sm:$0xff] %v1987_v51  }
 0x1f2   :  { %2154 = vst [vmem:[%s3260_s12 + $0x30] sm:$0xff] %v1982_v54   ;;  %v2388_v63 = vpop.f32.mrb[24].mxu1 }
 0x1f3   :  { %v966_v2 = vpop.f32.mrb[25].mxu1 }
 0x1f4   :  { %v1271_v59 = vpop.f32.mrb[32].mxu0  ;;  %v2389_v4 = vpop.f32.mrb[26].mxu1 }
 0x1f5   :  { %v1273_v62 = vpop.f32.mrb[33].mxu0  ;;  %v2017_v5 = vpack.c.bf16 %v2389_v4, %v2388_v63  ;;  %v969_v6 = vpop.f32.mrb[27].mxu1 }
 0x1f6   :  { %v1275_v61 = vpop.f32.mrb[34].mxu0  ;;  %v2012_v7 = vpack.c.bf16 %v969_v6, %v966_v2 }
 0x1f7   :  { %v2032_v0 = vpack.c.bf16 %v1275_v61, %v1271_v59  ;;  %v1277_v1 = vpop.f32.mrb[35].mxu0  ;;  %2161 = vst [vmem:[%s3260_s12 + $0x68] sm:$0xff] %v2017_v5  }
 0x1f8   :  { %v2072_v3 = vpack.c.bf16 %v1277_v1, %v1273_v62  ;;  %2160 = vst [vmem:[%s3260_s12 + $0x60] sm:$0xff] %v2012_v7  }
 0x1f9   :  { %2033 = vst [vmem:[%s3261_s13] sm:$0xff] %v2032_v0  }
 0x1fa   :  { %2073 = vst [vmem:[#allocation4] sm:$0xff] %v2072_v3   ;;  %v2392_v11 = vpop.f32.mrb[28].mxu1 }
 0x1fb   :  { %v982_v14 = vpop.f32.mrb[29].mxu1 }
 0x1fc   :  { %v1281_v8 = vpop.f32.mrb[36].mxu0  ;;  %v2393_v18 = vpop.f32.mrb[30].mxu1 }
 0x1fd   :  { %v1283_v9 = vpop.f32.mrb[37].mxu0  ;;  %v2027_v60 = vpack.c.bf16 %v2393_v18, %v2392_v11  ;;  %v985_v16 = vpop.f32.mrb[31].mxu1 }
 0x1fe   :  { %v1285_v10 = vpop.f32.mrb[38].mxu0  ;;  %v2022_v19 = vpack.c.bf16 %v985_v16, %v982_v14 }
 0x1ff   :  { %v2037_v23 = vpack.c.bf16 %v1285_v10, %v1281_v8  ;;  %v1287_v13 = vpop.f32.mrb[39].mxu0  ;;  %2163 = vst [vmem:[%s3260_s12 + $0x78] sm:$0xff] %v2027_v60  }
 0x200   :  { %v2077_v15 = vpack.c.bf16 %v1287_v13, %v1283_v9  ;;  %2162 = vst [vmem:[%s3260_s12 + $0x70] sm:$0xff] %v2022_v19  }
 0x201   :  { %2164 = vst [vmem:[%s3261_s13 + $0x8] sm:$0xff] %v2037_v23  }
 0x202   :  { %2171 = vst [vmem:[#allocation4 + $0x8] sm:$0xff] %v2077_v15   ;;  %v2412_v22 = vpop.f32.mrb[32].mxu1 }
 0x203   :  { %v1384_v26 = vpop.f32.mrb[33].mxu1 }
 0x204   :  { %v1291_v17 = vpop.f32.mrb[40].mxu0  ;;  %v2413_v28 = vpop.f32.mrb[34].mxu1 }
 0x205   :  { %v1293_v20 = vpop.f32.mrb[41].mxu0  ;;  %v2117_v29 = vpack.c.bf16 %v2413_v28, %v2412_v22  ;;  %v1387_v30 = vpop.f32.mrb[35].mxu1 }
 0x206   :  { %v1295_v21 = vpop.f32.mrb[42].mxu0  ;;  %v2112_v32 = vpack.c.bf16 %v1387_v30, %v1384_v26 }
 0x207   :  { %v2042_v24 = vpack.c.bf16 %v1295_v21, %v1291_v17  ;;  %v1297_v25 = vpop.f32.mrb[43].mxu0  ;;  %2179 = vst [vmem:[%s3260_s12 + $0x88] sm:$0xff] %v2117_v29  }
 0x208   :  { %v2082_v27 = vpack.c.bf16 %v1297_v25, %v1293_v20  ;;  %2178 = vst [vmem:[%s3260_s12 + $0x80] sm:$0xff] %v2112_v32  }
 0x209   :  { %2165 = vst [vmem:[%s3261_s13 + $0x10] sm:$0xff] %v2042_v24  }
 0x20a   :  { %2172 = vst [vmem:[#allocation4 + $0x10] sm:$0xff] %v2082_v27   ;;  %v2416_v12 = vpop.f32.mrb[36].mxu1 }
 0x20b   :  { %v1400_v38 = vpop.f32.mrb[37].mxu1 }
 0x20c   :  { %v1301_v34 = vpop.f32.mrb[44].mxu0  ;;  %v2417_v41 = vpop.f32.mrb[38].mxu1 }
 0x20d   :  { %v1303_v35 = vpop.f32.mrb[45].mxu0  ;;  %v2127_v42 = vpack.c.bf16 %v2417_v41, %v2416_v12  ;;  %v1403_v43 = vpop.f32.mrb[39].mxu1 }
 0x20e   :  { %v1305_v36 = vpop.f32.mrb[46].mxu0  ;;  %v2122_v44 = vpack.c.bf16 %v1403_v43, %v1400_v38 }
 0x20f   :  { %v2047_v33 = vpack.c.bf16 %v1305_v36, %v1301_v34  ;;  %v1307_v37 = vpop.f32.mrb[47].mxu0  ;;  %2181 = vst [vmem:[%s3260_s12 + $0x98] sm:$0xff] %v2127_v42  }
 0x210   :  { %v2087_v39 = vpack.c.bf16 %v1307_v37, %v1303_v35  ;;  %2180 = vst [vmem:[%s3260_s12 + $0x90] sm:$0xff] %v2122_v44  }
 0x211   :  { %2166 = vst [vmem:[%s3261_s13 + $0x18] sm:$0xff] %v2047_v33  }
 0x212   :  { %2173 = vst [vmem:[#allocation4 + $0x18] sm:$0xff] %v2087_v39   ;;  %v2420_v47 = vpop.f32.mrb[40].mxu1 }
 0x213   :  { %v1416_v31 = vpop.f32.mrb[41].mxu1 }
 0x214   :  { %v1311_v45 = vpop.f32.mrb[48].mxu0  ;;  %v2421_v51 = vpop.f32.mrb[42].mxu1 }
 0x215   :  { %v1313_v40 = vpop.f32.mrb[49].mxu0  ;;  %v2137_v52 = vpack.c.bf16 %v2421_v51, %v2420_v47  ;;  %v1419_v53 = vpop.f32.mrb[43].mxu1 }
 0x216   :  { %v1315_v46 = vpop.f32.mrb[50].mxu0  ;;  %v2132_v54 = vpack.c.bf16 %v1419_v53, %v1416_v31 }
 0x217   :  { %v2052_v48 = vpack.c.bf16 %v1315_v46, %v1311_v45  ;;  %v1317_v49 = vpop.f32.mrb[51].mxu0  ;;  %2183 = vst [vmem:[%s3260_s12 + $0xa8] sm:$0xff] %v2137_v52  }
 0x218   :  { %v2092_v50 = vpack.c.bf16 %v1317_v49, %v1313_v40  ;;  %2182 = vst [vmem:[%s3260_s12 + $0xa0] sm:$0xff] %v2132_v54  }
 0x219   :  { %2167 = vst [vmem:[%s3261_s13 + $0x20] sm:$0xff] %v2052_v48  }
 0x21a   :  { %2174 = vst [vmem:[#allocation4 + $0x20] sm:$0xff] %v2092_v50   ;;  %v2424_v58 = vpop.f32.mrb[44].mxu1 }
 0x21b   :  { %v1432_v61 = vpop.f32.mrb[45].mxu1 }
 0x21c   :  { %v1321_v55 = vpop.f32.mrb[52].mxu0  ;;  %v2425_v0 = vpop.f32.mrb[46].mxu1 }
 0x21d   :  { %v1323_v56 = vpop.f32.mrb[53].mxu0  ;;  %v2147_v1 = vpack.c.bf16 %v2425_v0, %v2424_v58  ;;  %v1435_v2 = vpop.f32.mrb[47].mxu1 }
 0x21e   :  { %v1325_v57 = vpop.f32.mrb[54].mxu0  ;;  %v2142_v3 = vpack.c.bf16 %v1435_v2, %v1432_v61 }
 0x21f   :  { %v2057_v59 = vpack.c.bf16 %v1325_v57, %v1321_v55  ;;  %v1327_v62 = vpop.f32.mrb[55].mxu0  ;;  %2185 = vst [vmem:[%s3260_s12 + $0xb8] sm:$0xff] %v2147_v1  }
 0x220   :  { %v2097_v63 = vpack.c.bf16 %v1327_v62, %v1323_v56  ;;  %2184 = vst [vmem:[%s3260_s12 + $0xb0] sm:$0xff] %v2142_v3  }
 0x221   :  { %2168 = vst [vmem:[%s3261_s13 + $0x28] sm:$0xff] %v2057_v59  }
 0x222   :  { %2175 = vst [vmem:[#allocation4 + $0x28] sm:$0xff] %v2097_v63  }
 0x224   :  { %v1331_v4 = vpop.f32.mrb[56].mxu0 }
 0x225   :  { %v1333_v5 = vpop.f32.mrb[57].mxu0 }
 0x226   :  { %v1335_v6 = vpop.f32.mrb[58].mxu0 }
 0x227   :  { %v2062_v7 = vpack.c.bf16 %v1335_v6, %v1331_v4  ;;  %v1337_v8 = vpop.f32.mrb[59].mxu0 }
 0x228   :  { %v2102_v9 = vpack.c.bf16 %v1337_v8, %v1333_v5 }
 0x229   :  { %2169 = vst [vmem:[%s3261_s13 + $0x30] sm:$0xff] %v2062_v7  }
 0x22a   :  { %2176 = vst [vmem:[#allocation4 + $0x30] sm:$0xff] %v2102_v9  }
 0x22c   :  { %v1341_v10 = vpop.f32.mrb[60].mxu0 }
 0x22d   :  { %v1343_v11 = vpop.f32.mrb[61].mxu0 }
 0x22e   :  { %v1345_v23 = vpop.f32.mrb[62].mxu0 }
 0x22f   :  { %v2067_v13 = vpack.c.bf16 %v1345_v23, %v1341_v10  ;;  %v1347_v14 = vpop.f32.mrb[63].mxu0 }
 0x230   :  { %v2107_v15 = vpack.c.bf16 %v1347_v14, %v1343_v11 }
 0x231   :  { %2170 = vst [vmem:[%s3261_s13 + $0x38] sm:$0xff] %v2067_v13  }
 0x232   :  { %2177 = vst [vmem:[#allocation4 + $0x38] sm:$0xff] %v2107_v15  }
 0x233   :  { %2530 = shalt.err (!%p2527_p12)
}
 0x234   :  { %s2531_s25 = scalar_lea.hbm %s3262_s14, 1024 }
 0x235   :  { %p2532_p13 = scmp.ne.s32.totalorder %s3262_s14, %s2531_s25  ;;  %p2535_p0 = scmp.lt.u32.totalorder %s2531_s25, %s3262_s14 }
 0x237   :  { %p2537_p1 = pnand %p2535_p0, %p2532_p13 }
 0x239   :  { %2540 = shalt.err (!%p2537_p1)
}
 0x23a   :  { %s2550_s13 = smov 64   ;;  %s2551_s2 = smov 4  }
 0x23b   :  { %1716 = dma.vmem_to_hbm [thread:$0]  %s1711_s1, 1024, %s3262_s14, [#allocation5], %s2550_s13, %s2550_s13, %s2551_s2  }
 0x23c   :  { %2541 = dma.done.wait [#allocation3], 2048  }
 0x23d   :  { %2542 = vsyncadd [#allocation3], 4294965248 }
 0x23e   :  { %2543 = dma.done.wait [#allocation5], 1024  }
 0x23f   :  { %2544 = vsyncadd [#allocation5], 4294966272 }
 0x240   :  { %1729 = vsyncpa [#allocation3], 1 }
 0x241   :  { %1730 = vsyncpa [#allocation5], 1 }

// kernel: model_forward.11
= control target key start
LH: loop header
LB: loop body
LE: loop exit
PB: predicated region body
PF: predicated region fallthrough
CT: control target
= control target key end

     0   :  { %v687_v0 = vmov 0.0   ;;  %vm688_vm0 = vmmov 0   ;;  %s902_s2 = inlined_call_operand.vmem [shape: bf16[128,128], index: 2, kind: input, shape index: {}]   ;;  %s903_s5 = inlined_call_operand.vmem [shape: bf16[128,128], index: 5, kind: input, shape index: {}]   ;;  %s904_s4 = inlined_call_operand.vmem [shape: bf16[128,128], index: 4, kind: input, shape index: {}]   ;;  %s905_s0 = inlined_call_operand.vmem [shape: f32[16,128], index: 0, kind: input, shape index: {}]   ;;  %s906_s1 = inlined_call_operand.vmem [shape: f32[16,128], index: 1, kind: input, shape index: {}]   ;;  %s907_s7 = inlined_call_operand.vmem [shape: bf16[128,128], index: 7, kind: input, shape index: {}]   ;;  %s908_s3 = inlined_call_operand.vmem [shape: f32[1,128], index: 3, kind: input, shape index: {}]   ;;  %s909_s6 = inlined_call_operand.vmem [shape: f32[1,128], index: 6, kind: input, shape index: {}]   ;;  %s910_s8 = inlined_call_operand.vmem [shape: f32[1,128], index: 8, kind: input, shape index: {}]   ;;  %s911_s9 = inlined_call_operand.vmem [shape: f32[16,128], index: 9, kind: output, shape index: {}]  }
   0x1   :  { %573 = vmatprep.subr.bf16.mxu0 %v687_v0  ;;  %v655_v1 = vld [vmem:[%s902_s2] sm:$0xff]   ;;  %589 = vmatprep.mubr.msk.bf16.mxu0 %vm688_vm0, %v687_v0  ;;  %v656_v2 = vld [vmem:[%s902_s2 + $0x8] sm:$0xff]   ;;  %v657_v3 = vld [vmem:[%s902_s2 + $0x10] sm:$0xff]  }
   0x2   :  { %593 = vmatprep.subr.bf16.mxu1 %v687_v0  ;;  %609 = vmatprep.mubr.msk.bf16.mxu1 %vm688_vm0, %v687_v0  ;;  %v663_v4 = vld [vmem:[%s903_s5] sm:$0xff]   ;;  %v658_v5 = vld [vmem:[%s902_s2 + $0x18] sm:$0xff]   ;;  %v665_v6 = vld [vmem:[%s903_s5 + $0x8] sm:$0xff]  }
   0x3   :  { %574 = vmatpush3.bf16.msra.mxu0 %v655_v1  ;;  %594 = vmatpush3.bf16.msra.mxu1 %v663_v4  ;;  %v659_v7 = vld [vmem:[%s902_s2 + $0x20] sm:$0xff]   ;;  %v667_v8 = vld [vmem:[%s903_s5 + $0x10] sm:$0xff]   ;;  %v660_v9 = vld [vmem:[%s902_s2 + $0x28] sm:$0xff]  }
   0x4   :  { %575 = vmatprep.subr.bf16.mxu0 %v687_v0  ;;  %595 = vmatprep.subr.bf16.mxu1 %v687_v0  ;;  %v669_v10 = vld [vmem:[%s903_s5 + $0x18] sm:$0xff]   ;;  %v661_v11 = vld [vmem:[%s902_s2 + $0x30] sm:$0xff]   ;;  %v671_v12 = vld [vmem:[%s903_s5 + $0x20] sm:$0xff]  }
   0x5   :  { %v662_v13 = vld [vmem:[%s902_s2 + $0x38] sm:$0xff]   ;;  %v33_v14 = vld [vmem:[%s905_s0] sm:$0xff]  ;;  %v34_v15 = vld [vmem:[%s905_s0 + $0x8] sm:$0xff] }
   0x6   :  { %v673_v16 = vld [vmem:[%s903_s5 + $0x28] sm:$0xff]   ;;  %v35_v17 = vpack.c.bf16 %v34_v15, %v33_v14  ;;  %v664_v18 = vld [vmem:[%s904_s4] sm:$0xff]   ;;  %v668_v20 = vld [vmem:[%s904_s4 + $0x10] sm:$0xff]  }
   0x7   :  { %576 = vmatpush3.bf16.msra.mxu0 %v656_v2  ;;  %596 = vmatpush3.bf16.msra.mxu1 %v665_v6  ;;  %v666_v19 = vld [vmem:[%s904_s4 + $0x8] sm:$0xff]   ;;  %v670_v21 = vld [vmem:[%s904_s4 + $0x18] sm:$0xff]   ;;  %v672_v22 = vld [vmem:[%s904_s4 + $0x20] sm:$0xff]  }
   0x8   :  { %577 = vmatprep.subr.bf16.mxu0 %v687_v0  ;;  %597 = vmatprep.subr.bf16.mxu1 %v687_v0  ;;  %v674_v23 = vld [vmem:[%s904_s4 + $0x28] sm:$0xff]   ;;  %v675_v24 = vld [vmem:[%s903_s5 + $0x30] sm:$0xff]   ;;  %v677_v26 = vld [vmem:[%s903_s5 + $0x38] sm:$0xff]  }
   0x9   :  { %v676_v25 = vld [vmem:[%s904_s4 + $0x30] sm:$0xff]   ;;  %v171_v27 = vld [vmem:[%s906_s1] sm:$0xff]  ;;  %v172_v28 = vld [vmem:[%s906_s1 + $0x8] sm:$0xff] }
   0xa   :  { %v173_v29 = vpack.c.bf16 %v172_v28, %v171_v27  ;;  %v678_v30 = vld [vmem:[%s904_s4 + $0x38] sm:$0xff]   ;;  %v679_v31 = vld [vmem:[%s907_s7] sm:$0xff]   ;;  %v680_v32 = vld [vmem:[%s907_s7 + $0x8] sm:$0xff]  }
   0xb   :  { %578 = vmatpush3.bf16.msra.mxu0 %v657_v3  ;;  %598 = vmatpush3.bf16.msra.mxu1 %v667_v8  ;;  %v681_v33 = vld [vmem:[%s907_s7 + $0x10] sm:$0xff]   ;;  %v682_v34 = vld [vmem:[%s907_s7 + $0x18] sm:$0xff]   ;;  %v683_v35 = vld [vmem:[%s907_s7 + $0x20] sm:$0xff]  }
   0xc   :  { %579 = vmatprep.subr.bf16.mxu0 %v687_v0  ;;  %599 = vmatprep.subr.bf16.mxu1 %v687_v0  ;;  %v502_v36 = vld [vmem:[%s908_s3] ss:$0 sm:$0xff]  ;;  %v684_v51 = vld [vmem:[%s907_s7 + $0x28] sm:$0xff]   ;;  %v685_v53 = vld [vmem:[%s907_s7 + $0x30] sm:$0xff]  }
   0xd   :  { %v686_v54 = vld [vmem:[%s907_s7 + $0x38] sm:$0xff]   ;;  %v527_v56 = vld [vmem:[%s909_s6] ss:$0 sm:$0xff] }
   0xf   :  { %580 = vmatpush3.bf16.msra.mxu0 %v658_v5  ;;  %600 = vmatpush3.bf16.msra.mxu1 %v669_v10  ;;  %v528_v5 = vld [vmem:[%s910_s8] ss:$0 sm:$0xff] }
  0x10   :  { %581 = vmatprep.subr.bf16.mxu0 %v687_v0  ;;  %601 = vmatprep.subr.bf16.mxu1 %v687_v0 }
  0x13   :  { %582 = vmatpush3.bf16.msra.mxu0 %v659_v7  ;;  %602 = vmatpush3.bf16.msra.mxu1 %v671_v12 }
  0x14   :  { %583 = vmatprep.subr.bf16.mxu0 %v687_v0  ;;  %603 = vmatprep.subr.bf16.mxu1 %v687_v0 }
  0x17   :  { %584 = vmatpush3.bf16.msra.mxu0 %v660_v9  ;;  %604 = vmatpush3.bf16.msra.mxu1 %v673_v16 }
  0x18   :  { %585 = vmatprep.subr.bf16.mxu0 %v687_v0  ;;  %605 = vmatprep.subr.bf16.mxu1 %v687_v0 }
  0x1b   :  { %586 = vmatpush3.bf16.msra.mxu0 %v661_v11  ;;  %606 = vmatpush3.bf16.msra.mxu1 %v675_v24 }
  0x1c   :  { %587 = vmatprep.subr.bf16.mxu0 %v687_v0  ;;  %607 = vmatprep.subr.bf16.mxu1 %v687_v0 }
  0x1f   :  { %588 = vmatpush3.bf16.msra.mxu0 %v662_v13  ;;  %608 = vmatpush3.bf16.msra.mxu1 %v677_v26 }
  0x20   :  { %613 = vmatprep.subr.bf16.mxu0 %v687_v0  ;;  %633 = vmatprep.subr.bf16.mxu1 %v687_v0 }
  0x22   :  { %590 = vmatmul.mubr.bf16.vlgmr.msra.gmra.mrb[0].mxu0 %v35_v17  ;;  %610 = vmatmul.mubr.bf16.vlgmr.msra.gmra.mrb[0].mxu1 %v173_v29 }
  0x23   :  { %614 = vmatpush3.bf16.msra.mxu0 %v664_v18  ;;  %629 = vmatprep.mubr.msk.bf16.mxu0 %vm688_vm0, %v687_v0 }
  0x24   :  { %615 = vmatprep.subr.bf16.mxu0 %v687_v0  ;;  %649 = vmatprep.mubr.msk.bf16.mxu1 %vm688_vm0, %v687_v0 }
  0x25   :  { %634 = vmatpush3.bf16.msra.mxu1 %v679_v31 }
  0x26   :  { %635 = vmatprep.subr.bf16.mxu1 %v687_v0 }
  0x27   :  { %616 = vmatpush3.bf16.msra.mxu0 %v666_v19 }
  0x28   :  { %617 = vmatprep.subr.bf16.mxu0 %v687_v0 }
  0x29   :  { %636 = vmatpush3.bf16.msra.mxu1 %v680_v32 }
  0x2a   :  { %637 = vmatprep.subr.bf16.mxu1 %v687_v0 }
  0x2b   :  { %618 = vmatpush3.bf16.msra.mxu0 %v668_v20 }
  0x2c   :  { %619 = vmatprep.subr.bf16.mxu0 %v687_v0 }
  0x2d   :  { %638 = vmatpush3.bf16.msra.mxu1 %v681_v33 }
  0x2e   :  { %639 = vmatprep.subr.bf16.mxu1 %v687_v0 }
  0x2f   :  { %620 = vmatpush3.bf16.msra.mxu0 %v670_v21 }
  0x30   :  { %621 = vmatprep.subr.bf16.mxu0 %v687_v0 }
  0x31   :  { %640 = vmatpush3.bf16.msra.mxu1 %v682_v34 }
  0x32   :  { %641 = vmatprep.subr.bf16.mxu1 %v687_v0 }
  0x33   :  { %622 = vmatpush3.bf16.msra.mxu0 %v672_v22 }
  0x34   :  { %623 = vmatprep.subr.bf16.mxu0 %v687_v0 }
  0x35   :  { %642 = vmatpush3.bf16.msra.mxu1 %v683_v35 }
  0x36   :  { %643 = vmatprep.subr.bf16.mxu1 %v687_v0 }
  0x37   :  { %624 = vmatpush3.bf16.msra.mxu0 %v674_v23 }
  0x38   :  { %625 = vmatprep.subr.bf16.mxu0 %v687_v0 }
  0x39   :  { %644 = vmatpush3.bf16.msra.mxu1 %v684_v51 }
  0x3a   :  { %645 = vmatprep.subr.bf16.mxu1 %v687_v0 }
  0x3b   :  { %626 = vmatpush3.bf16.msra.mxu0 %v676_v25 }
  0x3c   :  { %627 = vmatprep.subr.bf16.mxu0 %v687_v0 }
  0x3d   :  { %646 = vmatpush3.bf16.msra.mxu1 %v685_v53 }
  0x3e   :  { %647 = vmatprep.subr.bf16.mxu1 %v687_v0 }
  0x3f   :  { %628 = vmatpush3.bf16.msra.mxu0 %v678_v30 }
  0x41   :  { %648 = vmatpush3.bf16.msra.mxu1 %v686_v54 }
  0xf5   :  { %v141_v37 = vpop.f32.mrb[0].mxu0  ;;  %v272_v48 = vpop.f32.mrb[0].mxu1 }
  0xf6   :  { %v142_v38 = vadd.f32 %v502_v36, %v141_v37  ;;  %v591_v39 = vpop.f32.mrb[1].mxu0  ;;  %v611_v49 = vpop.f32.mrb[1].mxu1 }
  0xf7   :  { %v144_v40 = vpop.f32.mrb[2].mxu0  ;;  %v275_v50 = vpop.f32.mrb[2].mxu1 }
  0xf8   :  { %v150_v41 = vmul.f32 0.01, %v142_v38  ;;  %v145_v42 = vadd.f32 %v502_v36, %v144_v40  ;;  %v592_v43 = vpop.f32.mrb[3].mxu0  ;;  %vm148_vm1 = vcmp.ge.f32.partialorder %v142_v38, 0.0  ;;  %v612_v52 = vpop.f32.mrb[3].mxu1 }
  0xfa   :  { %vm149_vm2 = vcmp.ge.f32.partialorder %v145_v42, 0.0  ;;  %v151_v44 = vmul.f32 0.01, %v145_v42  ;;  %v152_v45 = vsel %vm148_vm1, %v142_v38, %v150_v41 }
  0xfc   :  { %v153_v46 = vsel %vm149_vm2, %v145_v42, %v151_v44 }
  0xfd   :  { %v154_v47 = vpack.c.bf16 %v153_v46, %v152_v45 }
  0xff   :  { %630 = vmatmul.mubr.bf16.vlgmr.msra.gmra.mrb[4].mxu0 %v154_v47 }
 0x1d2   :  { %v361_v55 = vpop.f32.mrb[4].mxu0 }
 0x1d3   :  { %v362_v57 = vadd.f32 %v361_v55, %v272_v48  ;;  %v631_v58 = vpop.f32.mrb[5].mxu0 }
 0x1d4   :  { %v364_v59 = vpop.f32.mrb[6].mxu0 }
 0x1d5   :  { %v375_v60 = vadd.f32 %v527_v56, %v362_v57  ;;  %v365_v61 = vadd.f32 %v364_v59, %v275_v50  ;;  %v632_v62 = vpop.f32.mrb[7].mxu0 }
 0x1d7   :  { %v379_v63 = vmul.f32 0.01, %v375_v60  ;;  %v376_v1 = vadd.f32 %v527_v56, %v365_v61  ;;  %vm377_vm3 = vcmp.ge.f32.partialorder %v375_v60, 0.0 }
 0x1d9   :  { %vm378_vm4 = vcmp.ge.f32.partialorder %v376_v1, 0.0  ;;  %v380_v0 = vmul.f32 0.01, %v376_v1  ;;  %v381_v2 = vsel %vm377_vm3, %v375_v60, %v379_v63 }
 0x1db   :  { %v382_v3 = vsel %vm378_vm4, %v376_v1, %v380_v0 }
 0x1dc   :  { %v383_v4 = vpack.c.bf16 %v382_v3, %v381_v2 }
 0x1de   :  { %650 = vmatmul.mubr.bf16.vlgmr.msra.gmra.mrb[4].mxu1 %v383_v4 }
 0x2b1   :  { %v489_v6 = vpop.f32.mrb[4].mxu1 }
 0x2b2   :  { %v490_v7 = vadd.f32 %v528_v5, %v489_v6  ;;  %v651_v8 = vpop.f32.mrb[5].mxu1 }
 0x2b3   :  { %v492_v9 = vpop.f32.mrb[6].mxu1 }
 0x2b4   :  { %496 = vst [vmem:[%s911_s9] sm:$0xff] %v490_v7  ;;  %v493_v10 = vadd.f32 %v528_v5, %v492_v9  ;;  %v652_v11 = vpop.f32.mrb[7].mxu1 }
 0x2b6   :  { %497 = vst [vmem:[%s911_s9 + $0x8] sm:$0xff] %v493_v10 }

</bundles_post_ra>
